<compile_context>
chip_gen: v7x
topology: tpu7x:2x2x1
jax: 0.10.0
libtpu: 0.0.40
codegen_flags: <defaults>
</compile_context>

<pallas_src>
import jax
import jax.numpy as jnp
from jax.experimental import pallas as pl
from jax.experimental.pallas import tpu as pltpu


def _round_up(x, m):
    return ((x + m - 1) // m) * m


def gated_fusion_kernel(img_ref, txt_ref, w_img_ref, w_txt_ref,
                        bi_ref, bt_ref, bg_ref, out_ref):
    D = out_ref.shape[-1]
    img = img_ref[...]                          # (tb, D)  bf16/f32
    txt = txt_ref[...]                          # (tb, D)

    # Two fused MXU matmuls; columns [0:D] -> projection, [D:2D] -> gate logits.
    acc_img = jnp.dot(img, w_img_ref[...], preferred_element_type=jnp.float32)
    acc_txt = jnp.dot(txt, w_txt_ref[...], preferred_element_type=jnp.float32)

    img_proj = acc_img[:, :D] + bi_ref[...]
    txt_proj = acc_txt[:, :D] + bt_ref[...]
    gate = jax.nn.sigmoid(acc_img[:, D:] + acc_txt[:, D:] + bg_ref[...])  # EUP

    # txt + g*(img - txt) == g*img + (1-g)*txt, one fewer VPU op per element.
    fused = txt_proj + gate * (img_proj - txt_proj)
    out_ref[...] = fused.astype(out_ref.dtype)


def fuse_params(params, mxu_dtype=jnp.bfloat16):
    """Concatenate the shared-LHS weights and cast MXU operands."""
    wi, bi, wt, bt, wg_img, wg_txt, bg = params
    w_img_cat = jnp.concatenate([wi, wg_img], axis=1).astype(mxu_dtype)  # (D, 2D)
    w_txt_cat = jnp.concatenate([wt, wg_txt], axis=1).astype(mxu_dtype)  # (D, 2D)
    return (w_img_cat, w_txt_cat,
            bi.astype(jnp.float32), bt.astype(jnp.float32), bg.astype(jnp.float32))


def gated_fusion(image_features, text_features, params, *, tb=256,
                 mxu_dtype=jnp.bfloat16):
    """image_features, text_features: (B, D) float32; D must be a multiple of 128."""
    B, D = image_features.shape
    assert D % 128 == 0, "feature dim must be lane-aligned (multiple of 128)"

    w_img, w_txt, bi, bt, bg = fuse_params(params, mxu_dtype)

    # Batch tile: as large as requested but no larger than the (padded) batch,
    # multiple of 16 so bf16 sublane packing is clean. Ragged batches are padded.
    tb_eff = _round_up(max(16, min(tb, _round_up(B, 16))), 16)
    Bp = _round_up(B, tb_eff)
    if Bp != B:
        pad = ((0, Bp - B), (0, 0))
        image_features = jnp.pad(image_features, pad)
        text_features = jnp.pad(text_features, pad)

    img = image_features.astype(mxu_dtype)
    txt = text_features.astype(mxu_dtype)

    grid = (Bp // tb_eff,)
    itm = jnp.dtype(mxu_dtype).itemsize

    # VMEM budget: double-buffered feature/out tiles + fused weights + f32
    # intermediates, with 2x headroom; floor 32 MiB, capped below v7x's 64 MiB.
    est = (2 * (2 * tb_eff * D * itm + tb_eff * D * 4)
           + 2 * (2 * D * 2 * D * itm)
           + 6 * tb_eff * D * 4)
    vmem_limit = int(min(max(2 * est, 32 * 1024 * 1024), 56 * 1024 * 1024))

    cost = pl.CostEstimate(
        flops=8 * Bp * D * D,                      # two (Bp,D)x(D,2D) matmuls
        transcendentals=Bp * D,                    # sigmoid
        bytes_accessed=(2 * Bp * D * itm           # img + txt
                        + 2 * (2 * D * D) * itm    # fused weights
                        + 3 * D * 4                # biases
                        + Bp * D * 4))             # output

    feat_spec = pl.BlockSpec((tb_eff, D), lambda i: (i, 0))
    out_spec = pl.BlockSpec((tb_eff, D), lambda i: (i, 0))

    def run(single_buffer_weights):
        const_kw = {}
        if single_buffer_weights:
            # Constant-index blocks never change across grid steps; a single
            # VMEM buffer suffices and frees VMEM for a bigger batch tile.
            const_kw = dict(pipeline_mode=pl.Buffered(1))
        w_spec = pl.BlockSpec((D, 2 * D), lambda i: (0, 0), **const_kw)
        b_spec = pl.BlockSpec((1, D), lambda i: (0, 0), **const_kw)
        return pl.pallas_call(
            gated_fusion_kernel,
            out_shape=jax.ShapeDtypeStruct((Bp, D), jnp.float32),
            grid_spec=pltpu.PrefetchScalarGridSpec(
                num_scalar_prefetch=0,
                grid=grid,
                in_specs=[feat_spec, feat_spec,
                          w_spec, w_spec,
                          b_spec, b_spec, b_spec],
                out_specs=out_spec,
            ),
            compiler_params=pltpu.CompilerParams(
                dimension_semantics=("parallel",),
                vmem_limit_bytes=vmem_limit,
            ),
            cost_estimate=cost,
        )(img, txt, w_img, w_txt, bi, bt, bg)

    try:
        out = jax.block_until_ready(run(single_buffer_weights=True))
    except Exception:
        # Installed jax rejects single-buffered pipeline_mode: fall back to the
        # default double-buffered specs (semantically identical).
        out = run(single_buffer_weights=False)

    return out[:B]


def init_params(key, dim):
    """Deterministic synthetic parameters (shapes match nn.Linear of the module,
    stored transposed as (D_in, D_out))."""
    ks = jax.random.split(key, 6)
    scale = 0.02
    wi = jax.random.normal(ks[0], (dim, dim), jnp.float32) * scale
    bi = jax.random.normal(ks[1], (1, dim), jnp.float32) * scale
    wt = jax.random.normal(ks[2], (dim, dim), jnp.float32) * scale
    bt = jax.random.normal(ks[3], (1, dim), jnp.float32) * scale
    # gate_net Linear has weight (dim, 2*dim) after transpose; split img/txt parts.
    wg = jax.random.normal(ks[4], (2 * dim, dim), jnp.float32) * scale
    wg_img, wg_txt = wg[:dim], wg[dim:]
    bg = jax.random.normal(ks[5], (1, dim), jnp.float32) * scale
    return wi, bi, wt, bt, wg_img, wg_txt, bg


def gated_fusion_ref(image_features, text_features, params):
    wi, bi, wt, bt, wg_img, wg_txt, bg = params
    img_proj = image_features @ wi + bi
    txt_proj = text_features @ wt + bt
    gate = jax.nn.sigmoid(image_features @ wg_img + text_features @ wg_txt + bg)
    return gate * img_proj + (1.0 - gate) * txt_proj


if __name__ == "__main__":
    dim = 128     # small, lane-aligned stand-in for 768
    batch = 50    # intentionally ragged: exercises the padded-tile path

    key = jax.random.PRNGKey(0)
    k_img, k_txt, k_par = jax.random.split(key, 3)
    image_features = jax.random.normal(k_img, (batch, dim), jnp.float32)
    text_features = jax.random.normal(k_txt, (batch, dim), jnp.float32)
    params = init_params(k_par, dim)

    ref = gated_fusion_ref(image_features, text_features, params)

    # f32 MXU operands, small tile -> multi-step grid: checks kernel math tightly.
    out_f32 = jax.block_until_ready(
        gated_fusion(image_features, text_features, params,
                     tb=32, mxu_dtype=jnp.float32))
    assert out_f32.shape == (batch, dim)
    assert jnp.allclose(out_f32, ref, atol=1e-4, rtol=1e-4)

    # bf16 MXU operands (the performance configuration): loose numerical check.
    out_bf16 = jax.block_until_ready(
        gated_fusion(image_features, text_features, params,
                     tb=256, mxu_dtype=jnp.bfloat16))
    assert out_bf16.shape == (batch, dim)
    assert jnp.allclose(out_bf16, ref, atol=2e-2, rtol=2e-2)

    print("KERNEL_OK")
</pallas_src>

<mosaic_0001>
module attributes {stable_mosaic.version = 11 : i64} {
  func.func @gated_fusion_kernel(%arg0: i32, %arg1: memref<32x128xf32, #tpu.memory_space<vmem>>, %arg2: memref<32x128xf32, #tpu.memory_space<vmem>>, %arg3: memref<128x256xf32, #tpu.memory_space<vmem>>, %arg4: memref<128x256xf32, #tpu.memory_space<vmem>>, %arg5: memref<1x128xf32, #tpu.memory_space<vmem>>, %arg6: memref<1x128xf32, #tpu.memory_space<vmem>>, %arg7: memref<1x128xf32, #tpu.memory_space<vmem>>, %arg8: memref<32x128xf32, #tpu.memory_space<vmem>>) attributes {dimension_semantics = [#tpu.dimension_semantics<parallel>], iteration_bounds = array<i64: 2>, scalar_prefetch = 0 : i64, scratch_operands = 0 : i64, tpu.core_type = #tpu.core_type<tc>, window_params = [{transform_indices = @transform_0, window_bounds = array<i64: 32, 128>}, {transform_indices = @transform_1, window_bounds = array<i64: 32, 128>}, {pipeline_mode = #tpu.pipeline_mode<synchronous>, transform_indices = @transform_2, window_bounds = array<i64: 128, 256>}, {pipeline_mode = #tpu.pipeline_mode<synchronous>, transform_indices = @transform_3, window_bounds = array<i64: 128, 256>}, {pipeline_mode = #tpu.pipeline_mode<synchronous>, transform_indices = @transform_4, window_bounds = array<i64: 1, 128>}, {pipeline_mode = #tpu.pipeline_mode<synchronous>, transform_indices = @transform_5, window_bounds = array<i64: 1, 128>}, {pipeline_mode = #tpu.pipeline_mode<synchronous>, transform_indices = @transform_6, window_bounds = array<i64: 1, 128>}, {transform_indices = @transform_7, window_bounds = array<i64: 32, 128>}]} {
    %c0 = arith.constant 0 : index
    %c0_0 = arith.constant 0 : index
    %0 = vector.load %arg1[%c0, %c0_0] : memref<32x128xf32, #tpu.memory_space<vmem>>, vector<32x128xf32>
    %c0_1 = arith.constant 0 : index
    %c0_2 = arith.constant 0 : index
    %1 = vector.load %arg2[%c0_1, %c0_2] : memref<32x128xf32, #tpu.memory_space<vmem>>, vector<32x128xf32>
    %c0_3 = arith.constant 0 : index
    %c0_4 = arith.constant 0 : index
    %2 = vector.load %arg3[%c0_3, %c0_4] : memref<128x256xf32, #tpu.memory_space<vmem>>, vector<128x256xf32>
    %cst = arith.constant dense<0.000000e+00> : vector<32x256xf32>
    %3 = tpu.matmul %0, %2, %cst {dimension_numbers = #tpu.dot_dimension_numbers<[1], [0], [0], [1], [0, 0, 1, 1], [], []>} : vector<32x128xf32>, vector<128x256xf32>, vector<32x256xf32> -> vector<32x256xf32>
    %c0_5 = arith.constant 0 : index
    %c0_6 = arith.constant 0 : index
    %4 = vector.load %arg4[%c0_5, %c0_6] : memref<128x256xf32, #tpu.memory_space<vmem>>, vector<128x256xf32>
    %cst_7 = arith.constant dense<0.000000e+00> : vector<32x256xf32>
    %5 = tpu.matmul %1, %4, %cst_7 {dimension_numbers = #tpu.dot_dimension_numbers<[1], [0], [0], [1], [0, 0, 1, 1], [], []>} : vector<32x128xf32>, vector<128x256xf32>, vector<32x256xf32> -> vector<32x256xf32>
    %6 = vector.extract_strided_slice %3 {offsets = [0, 0], sizes = [32, 128], strides = [1, 1]} : vector<32x256xf32> to vector<32x128xf32>
    %c0_8 = arith.constant 0 : index
    %c0_9 = arith.constant 0 : index
    %7 = vector.load %arg5[%c0_8, %c0_9] : memref<1x128xf32, #tpu.memory_space<vmem>>, vector<1x128xf32>
    %8 = vector.broadcast %7 : vector<1x128xf32> to vector<32x128xf32>
    %9 = arith.addf %6, %8 : vector<32x128xf32>
    %10 = vector.extract_strided_slice %5 {offsets = [0, 0], sizes = [32, 128], strides = [1, 1]} : vector<32x256xf32> to vector<32x128xf32>
    %c0_10 = arith.constant 0 : index
    %c0_11 = arith.constant 0 : index
    %11 = vector.load %arg6[%c0_10, %c0_11] : memref<1x128xf32, #tpu.memory_space<vmem>>, vector<1x128xf32>
    %12 = vector.broadcast %11 : vector<1x128xf32> to vector<32x128xf32>
    %13 = arith.addf %10, %12 : vector<32x128xf32>
    %14 = vector.extract_strided_slice %3 {offsets = [0, 128], sizes = [32, 128], strides = [1, 1]} : vector<32x256xf32> to vector<32x128xf32>
    %15 = vector.extract_strided_slice %5 {offsets = [0, 128], sizes = [32, 128], strides = [1, 1]} : vector<32x256xf32> to vector<32x128xf32>
    %16 = arith.addf %14, %15 : vector<32x128xf32>
    %c0_12 = arith.constant 0 : index
    %c0_13 = arith.constant 0 : index
    %17 = vector.load %arg7[%c0_12, %c0_13] : memref<1x128xf32, #tpu.memory_space<vmem>>, vector<1x128xf32>
    %18 = vector.broadcast %17 : vector<1x128xf32> to vector<32x128xf32>
    %19 = arith.addf %16, %18 : vector<32x128xf32>
    %20 = arith.negf %19 : vector<32x128xf32>
    %21 = math.exp %20 : vector<32x128xf32>
    %cst_14 = arith.constant 1.000000e+00 : f32
    %22 = vector.broadcast %cst_14 : f32 to vector<32x128xf32>
    %23 = arith.addf %22, %21 : vector<32x128xf32>
    %24 = arith.divf %22, %23 : vector<32x128xf32>
    %25 = arith.subf %9, %13 : vector<32x128xf32>
    %26 = arith.mulf %24, %25 : vector<32x128xf32>
    %27 = arith.addf %13, %26 : vector<32x128xf32>
    %c0_15 = arith.constant 0 : index
    %c0_16 = arith.constant 0 : index
    %28 = vector.load %arg8[%c0_15, %c0_16] : memref<32x128xf32, #tpu.memory_space<vmem>>, vector<32x128xf32>
    tpu.vector_store %arg8[%c0_15, %c0_16], %27 {strides = array<i32>} : memref<32x128xf32, #tpu.memory_space<vmem>>, vector<32x128xf32>,
    return
  }
  func.func @transform_0(%arg0: i32) -> (i32, i32) {
    %c0_i32 = arith.constant 0 : i32
    %c0_i32_0 = arith.constant 0 : i32
    return %arg0, %c0_i32 : i32, i32
  }
  func.func @transform_1(%arg0: i32) -> (i32, i32) {
    %c0_i32 = arith.constant 0 : i32
    %c0_i32_0 = arith.constant 0 : i32
    return %arg0, %c0_i32 : i32, i32
  }
  func.func @transform_2(%arg0: i32) -> (i32, i32) {
    %c0_i32 = arith.constant 0 : i32
    %c0_i32_0 = arith.constant 0 : i32
    %c0_i32_1 = arith.constant 0 : i32
    return %c0_i32, %c0_i32_0 : i32, i32
  }
  func.func @transform_3(%arg0: i32) -> (i32, i32) {
    %c0_i32 = arith.constant 0 : i32
    %c0_i32_0 = arith.constant 0 : i32
    %c0_i32_1 = arith.constant 0 : i32
    return %c0_i32, %c0_i32_0 : i32, i32
  }
  func.func @transform_4(%arg0: i32) -> (i32, i32) {
    %c0_i32 = arith.constant 0 : i32
    %c0_i32_0 = arith.constant 0 : i32
    %c0_i32_1 = arith.constant 0 : i32
    return %c0_i32, %c0_i32_0 : i32, i32
  }
  func.func @transform_5(%arg0: i32) -> (i32, i32) {
    %c0_i32 = arith.constant 0 : i32
    %c0_i32_0 = arith.constant 0 : i32
    %c0_i32_1 = arith.constant 0 : i32
    return %c0_i32, %c0_i32_0 : i32, i32
  }
  func.func @transform_6(%arg0: i32) -> (i32, i32) {
    %c0_i32 = arith.constant 0 : i32
    %c0_i32_0 = arith.constant 0 : i32
    %c0_i32_1 = arith.constant 0 : i32
    return %c0_i32, %c0_i32_0 : i32, i32
  }
  func.func @transform_7(%arg0: i32) -> (i32, i32) {
    %c0_i32 = arith.constant 0 : i32
    %c0_i32_0 = arith.constant 0 : i32
    return %arg0, %c0_i32 : i32, i32
  }
}

module attributes {stable_mosaic.version = 11 : i64} {
  func.func @gated_fusion_kernel(%arg0: i32, %arg1: memref<32x128xf32, #tpu.memory_space<vmem>>, %arg2: memref<32x128xf32, #tpu.memory_space<vmem>>, %arg3: memref<128x256xf32, #tpu.memory_space<vmem>>, %arg4: memref<128x256xf32, #tpu.memory_space<vmem>>, %arg5: memref<1x128xf32, #tpu.memory_space<vmem>>, %arg6: memref<1x128xf32, #tpu.memory_space<vmem>>, %arg7: memref<1x128xf32, #tpu.memory_space<vmem>>, %arg8: memref<32x128xf32, #tpu.memory_space<vmem>>) attributes {dimension_semantics = [#tpu.dimension_semantics<parallel>], iteration_bounds = array<i64: 2>, scalar_prefetch = 0 : i64, scratch_operands = 0 : i64, tpu.core_type = #tpu.core_type<tc>, window_params = [{transform_indices = @transform_0, window_bounds = array<i64: 32, 128>}, {transform_indices = @transform_1, window_bounds = array<i64: 32, 128>}, {pipeline_mode = #tpu.pipeline_mode<synchronous>, transform_indices = @transform_2, window_bounds = array<i64: 128, 256>}, {pipeline_mode = #tpu.pipeline_mode<synchronous>, transform_indices = @transform_3, window_bounds = array<i64: 128, 256>}, {pipeline_mode = #tpu.pipeline_mode<synchronous>, transform_indices = @transform_4, window_bounds = array<i64: 1, 128>}, {pipeline_mode = #tpu.pipeline_mode<synchronous>, transform_indices = @transform_5, window_bounds = array<i64: 1, 128>}, {pipeline_mode = #tpu.pipeline_mode<synchronous>, transform_indices = @transform_6, window_bounds = array<i64: 1, 128>}, {transform_indices = @transform_7, window_bounds = array<i64: 32, 128>}]} {
    %c0 = arith.constant 0 : index
    %c0_0 = arith.constant 0 : index
    %0 = vector.load %arg1[%c0, %c0_0] : memref<32x128xf32, #tpu.memory_space<vmem>>, vector<32x128xf32>
    %c0_1 = arith.constant 0 : index
    %c0_2 = arith.constant 0 : index
    %1 = vector.load %arg2[%c0_1, %c0_2] : memref<32x128xf32, #tpu.memory_space<vmem>>, vector<32x128xf32>
    %c0_3 = arith.constant 0 : index
    %c0_4 = arith.constant 0 : index
    %2 = vector.load %arg3[%c0_3, %c0_4] : memref<128x256xf32, #tpu.memory_space<vmem>>, vector<128x256xf32>
    %cst = arith.constant dense<0.000000e+00> : vector<32x256xf32>
    %3 = tpu.matmul %0, %2, %cst {dimension_numbers = #tpu.dot_dimension_numbers<[1], [0], [0], [1], [0, 0, 1, 1], [], []>} : vector<32x128xf32>, vector<128x256xf32>, vector<32x256xf32> -> vector<32x256xf32>
    %c0_5 = arith.constant 0 : index
    %c0_6 = arith.constant 0 : index
    %4 = vector.load %arg4[%c0_5, %c0_6] : memref<128x256xf32, #tpu.memory_space<vmem>>, vector<128x256xf32>
    %cst_7 = arith.constant dense<0.000000e+00> : vector<32x256xf32>
    %5 = tpu.matmul %1, %4, %cst_7 {dimension_numbers = #tpu.dot_dimension_numbers<[1], [0], [0], [1], [0, 0, 1, 1], [], []>} : vector<32x128xf32>, vector<128x256xf32>, vector<32x256xf32> -> vector<32x256xf32>
    %6 = vector.extract_strided_slice %3 {offsets = [0, 0], sizes = [32, 128], strides = [1, 1]} : vector<32x256xf32> to vector<32x128xf32>
    %c0_8 = arith.constant 0 : index
    %c0_9 = arith.constant 0 : index
    %7 = vector.load %arg5[%c0_8, %c0_9] : memref<1x128xf32, #tpu.memory_space<vmem>>, vector<1x128xf32>
    %8 = vector.broadcast %7 : vector<1x128xf32> to vector<32x128xf32>
    %9 = arith.addf %6, %8 : vector<32x128xf32>
    %10 = vector.extract_strided_slice %5 {offsets = [0, 0], sizes = [32, 128], strides = [1, 1]} : vector<32x256xf32> to vector<32x128xf32>
    %c0_10 = arith.constant 0 : index
    %c0_11 = arith.constant 0 : index
    %11 = vector.load %arg6[%c0_10, %c0_11] : memref<1x128xf32, #tpu.memory_space<vmem>>, vector<1x128xf32>
    %12 = vector.broadcast %11 : vector<1x128xf32> to vector<32x128xf32>
    %13 = arith.addf %10, %12 : vector<32x128xf32>
    %14 = vector.extract_strided_slice %3 {offsets = [0, 128], sizes = [32, 128], strides = [1, 1]} : vector<32x256xf32> to vector<32x128xf32>
    %15 = vector.extract_strided_slice %5 {offsets = [0, 128], sizes = [32, 128], strides = [1, 1]} : vector<32x256xf32> to vector<32x128xf32>
    %16 = arith.addf %14, %15 : vector<32x128xf32>
    %c0_12 = arith.constant 0 : index
    %c0_13 = arith.constant 0 : index
    %17 = vector.load %arg7[%c0_12, %c0_13] : memref<1x128xf32, #tpu.memory_space<vmem>>, vector<1x128xf32>
    %18 = vector.broadcast %17 : vector<1x128xf32> to vector<32x128xf32>
    %19 = arith.addf %16, %18 : vector<32x128xf32>
    %20 = arith.negf %19 : vector<32x128xf32>
    %21 = math.exp %20 : vector<32x128xf32>
    %cst_14 = arith.constant 1.000000e+00 : f32
    %22 = vector.broadcast %cst_14 : f32 to vector<32x128xf32>
    %23 = arith.addf %22, %21 : vector<32x128xf32>
    %24 = arith.divf %22, %23 : vector<32x128xf32>
    %25 = arith.subf %9, %13 : vector<32x128xf32>
    %26 = arith.mulf %24, %25 : vector<32x128xf32>
    %27 = arith.addf %13, %26 : vector<32x128xf32>
    %c0_15 = arith.constant 0 : index
    %c0_16 = arith.constant 0 : index
    %28 = vector.load %arg8[%c0_15, %c0_16] : memref<32x128xf32, #tpu.memory_space<vmem>>, vector<32x128xf32>
    tpu.vector_store %arg8[%c0_15, %c0_16], %27 {strides = array<i32>} : memref<32x128xf32, #tpu.memory_space<vmem>>, vector<32x128xf32>,
    return
  }
  func.func @transform_0(%arg0: i32) -> (i32, i32) {
    %c0_i32 = arith.constant 0 : i32
    %c0_i32_0 = arith.constant 0 : i32
    return %arg0, %c0_i32 : i32, i32
  }
  func.func @transform_1(%arg0: i32) -> (i32, i32) {
    %c0_i32 = arith.constant 0 : i32
    %c0_i32_0 = arith.constant 0 : i32
    return %arg0, %c0_i32 : i32, i32
  }
  func.func @transform_2(%arg0: i32) -> (i32, i32) {
    %c0_i32 = arith.constant 0 : i32
    %c0_i32_0 = arith.constant 0 : i32
    %c0_i32_1 = arith.constant 0 : i32
    return %c0_i32, %c0_i32_0 : i32, i32
  }
  func.func @transform_3(%arg0: i32) -> (i32, i32) {
    %c0_i32 = arith.constant 0 : i32
    %c0_i32_0 = arith.constant 0 : i32
    %c0_i32_1 = arith.constant 0 : i32
    return %c0_i32, %c0_i32_0 : i32, i32
  }
  func.func @transform_4(%arg0: i32) -> (i32, i32) {
    %c0_i32 = arith.constant 0 : i32
    %c0_i32_0 = arith.constant 0 : i32
    %c0_i32_1 = arith.constant 0 : i32
    return %c0_i32, %c0_i32_0 : i32, i32
  }
  func.func @transform_5(%arg0: i32) -> (i32, i32) {
    %c0_i32 = arith.constant 0 : i32
    %c0_i32_0 = arith.constant 0 : i32
    %c0_i32_1 = arith.constant 0 : i32
    return %c0_i32, %c0_i32_0 : i32, i32
  }
  func.func @transform_6(%arg0: i32) -> (i32, i32) {
    %c0_i32 = arith.constant 0 : i32
    %c0_i32_0 = arith.constant 0 : i32
    %c0_i32_1 = arith.constant 0 : i32
    return %c0_i32, %c0_i32_0 : i32, i32
  }
  func.func @transform_7(%arg0: i32) -> (i32, i32) {
    %c0_i32 = arith.constant 0 : i32
    %c0_i32_0 = arith.constant 0 : i32
    return %arg0, %c0_i32 : i32, i32
  }
}

</mosaic_0001>

<bundles_post_ra>
// kernel: tpu_custom_call.1
= control target key start
LH: loop header
LB: loop body
LE: loop exit
PB: predicated region body
PF: predicated region fallthrough
CT: control target
= control target key end

     0   :  { %s1589_s0 = inlined_call_operand.hbm [shape: f32[64,128], index: 0, kind: input, shape index: {}]   ;;  %s1590_s1 = inlined_call_operand.hbm [shape: f32[64,128], index: 1, kind: input, shape index: {}]   ;;  %s1591_s2 = inlined_call_operand.hbm [shape: f32[128,256], index: 2, kind: input, shape index: {}]   ;;  %s1592_s3 = inlined_call_operand.hbm [shape: f32[128,256], index: 3, kind: input, shape index: {}]   ;;  %s1593_s4 = inlined_call_operand.vmem [shape: f32[1,128], index: 4, kind: input, shape index: {}]   ;;  %s1594_s5 = inlined_call_operand.vmem [shape: f32[1,128], index: 5, kind: input, shape index: {}]   ;;  %s1595_s6 = inlined_call_operand.vmem [shape: f32[1,128], index: 6, kind: input, shape index: {}]   ;;  %s1596_s7 = inlined_call_operand.hbm [shape: f32[64,128], index: 7, kind: output, shape index: {}]  }
   0x1   :  { %1601 = sst [smem:[#allocation17_spill]] %s1589_s0 }
   0x2   :  { %1602 = sst [smem:[#allocation18_spill]] %s1591_s2 }
   0x3   :  { %1603 = sst [smem:[#allocation19_spill]] %s1592_s3 }
   0x4   :  { %12 = vsyncpa [#allocation3], 0 }
   0x5   :  { %14 = vsyncpa [#allocation3 + $0x1], 0 }
   0x6   :  { %15 = vsyncpa [#allocation6], 0 }
   0x7   :  { %17 = vsyncpa [#allocation6 + $0x1], 0 }
   0x8   :  { %18 = vsyncpa [#allocation9], 0 }
   0x9   :  { %19 = vsyncpa [#allocation4], 0 }
   0xa   :  { %21 = vsyncpa [#allocation4 + $0x1], 0  ;;  %s1264_s24 = smov 0   ;;  %s1266_s25 = smov 0  }
   0xb   :  { %s1268_s26 = smov 0   ;;  %s1270_s27 = smov 0  }
   0xc LB: > { %s1285_s28 = sadd.s32 4294967295, %s1210_s27   ;;  %s825_s29 = sadd.s32 4294967294, %s1210_s27   ;;  %s1210_s27 = sphi %s1270_s27, %s1628_s27   ;;  %s1206_s26 = sphi %s1268_s26, %s1627_s26   ;;  %s1202_s25 = sphi %s1266_s25, %s1626_s25   ;;  %s1198_s24 = sphi %s1264_s24, %s1625_s24  }
   0xd   : > { %p47_p0 = scmp.ne.s32.totalorder %s1202_s25, %s1198_s24  ;;  %p1597_p1 = scmp.eq.s32.totalorder %s1285_s28, 0 }
   0xe   : > { %p208_p3 = scmp.eq.s32.totalorder %s825_s29, 1  ;;  %p826_p5 = scmp.ge.s32.totalorder %s1210_s27, 1 }
   0xf   : > { %p1294_p4 = por %p1597_p1, %p47_p0  ;;  %p215_p7 = scmp.lt.s32.totalorder %s1210_s27, 3 }
  0x10   : > { %p1299_p6 = por %p208_p3, %p47_p0  ;;  %s1212_s10 = smov [#allocation7]  }
  0x11   : > { %s1604_s30 = scalar_select %p1294_p4, 1, 0 }
  0x12   : > { %s1605_s8 = scalar_select %p1299_p6, 1, 0 }
  0x13   : > { %p1304_p8 = pnand %p826_p5, %p215_p7  ;;  %s227_s11 = sshll.u32 %s1212_s10, 4  ;;  %s1308_s11 = int_to_ptr.vmem [resolvable:$true] %s227_s11 }
  0x14   : > { %s1213_s13 = smov [#allocation8]   ;;  %s1608_s2 = sld [smem:[#allocation18_spill]] }
  0x15   : > { %p935_p9 = pneg %p1304_p8  ;;  %s240_s14 = sshll.u32 %s1213_s13, 4  ;;  %s1319_s14 = int_to_ptr.vmem [resolvable:$true] %s240_s14 }
  0x17   : > { %p1315_p11 = pnand %p935_p9, %p1597_p1 }
  0x19   : > { %p1018_p13 = pneg %p1315_p11 }
  0x1a   : > { %s1016_s17 = scalar_lea.hbm %s1608_s2, 4096 }
  0x1b   : > { %p1017_p12 = scmp.ne.s32.totalorder %s1608_s2, %s1016_s17  ;;  %p1023_p5 = scmp.lt.u32.totalorder %s1016_s17, %s1608_s2 }
  0x1d   : > { %p1019_p0 = pnand %p1018_p13, %p1017_p12 }
  0x1f   : > { %p1020_p3 = pneg %p1019_p0 }
  0x21   : > { %p1025_p7 = pnand %p1023_p5, %p1020_p3 }
  0x23   : > { %1028 = shalt.err (!%p1025_p7)
}
  0x24   : > { %s1029_s22 = scalar_lea.vmem %s1308_s11, 4096  ;;  %p1037_p2 = scmp.lt.s32.totalorder %s1308_s11, %s1308_s11 }
  0x25   : > { %p1030_p9 = scmp.ne.s32.totalorder %s1308_s11, %s1029_s22  ;;  %p1038_p12 = scmp.lt.s32.totalorder %s1029_s22, %s1029_s22 }
  0x27   : > { %p1032_p10 = pnand %p1030_p9, %p1018_p13  ;;  %p1039_p0 = por %p1038_p12, %p1037_p2 }
  0x29   : > { %p1033_p1 = pneg %p1032_p10 }
  0x2b   : > { %p1040_p6 = pnand %p1039_p0, %p1033_p1 }
  0x2d   : > { %1043 = shalt.err (!%p1040_p6)
}
  0x2e   : > { %s1214_s23 = smov 256   ;;  %s1215_s29 = smov 16  }
  0x2f   : > { %938 = dma.hbm_to_vmem [thread:$0]  (!%p1315_p11), %s1608_s2, 4096, %s1308_s11, [#allocation6], %s1214_s23, %s1214_s23, %s1215_s29  }
  0x30   : > { %s1609_s3 = sld [smem:[#allocation19_spill]] }
  0x36   : > { %s1044_s17 = scalar_lea.hbm %s1609_s3, 4096 }
  0x37   : > { %p1045_p2 = scmp.ne.s32.totalorder %s1609_s3, %s1044_s17  ;;  %p1051_p10 = scmp.lt.u32.totalorder %s1044_s17, %s1609_s3 }
  0x39   : > { %p1047_p1 = pnand %p1045_p2, %p1018_p13 }
  0x3b   : > { %p1048_p6 = pneg %p1047_p1 }
  0x3d   : > { %p1053_p3 = pnand %p1051_p10, %p1048_p6 }
  0x3f   : > { %1056 = shalt.err (!%p1053_p3)
}
  0x40   : > { %s1057_s11 = scalar_lea.vmem %s1319_s14, 4096  ;;  %p1065_p12 = scmp.lt.s32.totalorder %s1319_s14, %s1319_s14 }
  0x41   : > { %p1058_p5 = scmp.ne.s32.totalorder %s1319_s14, %s1057_s11  ;;  %p1066_p0 = scmp.lt.s32.totalorder %s1057_s11, %s1057_s11 }
  0x43   : > { %p1060_p7 = pnand %p1058_p5, %p1018_p13  ;;  %p1067_p2 = por %p1066_p0, %p1065_p12 }
  0x45   : > { %p1061_p9 = pneg %p1060_p7 }
  0x47   : > { %p1068_p1 = pnand %p1067_p2, %p1061_p9 }
  0x49   : > { %1071 = shalt.err (!%p1068_p1)
}
  0x4a   : > { %941 = dma.hbm_to_vmem [thread:$0]  (!%p1315_p11), %s1609_s3, 4096, %s1319_s14, [#allocation9], %s1214_s23, %s1214_s23, %s1215_s29  }
  0x4b   : > { %s1374_s13 = sadd.s32 1, %s1210_s27   ;;  %s34_s12 = sadd.s32 1, %s1206_s26 }
  0x4c   : > { %s31_s15 = ssub.s32 %s1210_s27, %s1374_s13  ;;  %p41_p13 = scmp.ne.s32.totalorder %s1206_s26, %s1202_s25 }
  0x4d   : > { %p32_p6 = scmp.eq.s32.totalorder %s31_s15, 0  ;;  %p42_p10 = scmp.eq.s32.totalorder %s1210_s27, 0 }
  0x4e   : > { %p1610_p3 = scmp.eq.s32.totalorder %s1285_s28, 1  ;;  %p955_p7 = scmp.lt.s32.totalorder %s1210_s27, 2 }
  0x4f   : > { %s1390_s17 = scalar_select %p32_p6, %s1206_s26, %s34_s12  }
  0x50   : > { %p1384_p5 = por %p1610_p3, %p41_p13  ;;  %p43_p9 = por %p42_p10, %p41_p13 }
  0x51   : > { %1612 = sst [smem:[#allocation16_spill]] %s1390_s17  ;;  %s263_s18 = sand.u32 1, %s1206_s26  }
  0x52   : > { %s1611_s16 = scalar_select %p1384_p5, 1, 0 }
  0x53   : > { %s1393_s19 = sshll.u32 %s263_s18, 5  ;;  %s1598_s14 = sshll.u32 %s1210_s27, 9 }
  0x54   : > { %s1613_s0 = sld [smem:[#allocation17_spill]]  ;;  %s267_s21 = scalar_lea.vmem [#allocation2], %s1393_s19 }
  0x55   : > { %s274_s11 = sshll.u32 %s267_s21, 4  ;;  %p1406_p11 = pnand %p955_p7, %p43_p9  ;;  %s1404_s11 = int_to_ptr.vmem [resolvable:$true] %s274_s11 }
  0x56   : > { %s1410_s10 = scalar_lea.sflag [#allocation3], %s263_s18 }
  0x57   : > { %p1074_p0 = pneg %p1406_p11 }
  0x5a   : > { %s1401_s20 = scalar_lea.hbm %s1613_s0, %s1598_s14  ;;  %s1077_s29 = scalar_lea.hbm %s1613_s0, 1024 }
  0x5b   : > { %s1072_s12 = scalar_lea.hbm %s1401_s20, 512  ;;  %p1078_p13 = scmp.lt.u32.totalorder %s1401_s20, %s1613_s0 }
  0x5c   : > { %p1073_p12 = scmp.ne.s32.totalorder %s1401_s20, %s1072_s12  ;;  %p1079_p6 = scmp.lt.u32.totalorder %s1077_s29, %s1072_s12 }
  0x5d   : > { %p1081_p3 = scmp.lt.u32.totalorder %s1072_s12, %s1401_s20 }
  0x5e   : > { %p1075_p2 = pnand %p1074_p0, %p1073_p12  ;;  %p1080_p10 = por %p1079_p6, %p1078_p13 }
  0x60   : > { %p1076_p1 = pneg %p1075_p2  ;;  %p1082_p7 = por %p1081_p3, %p1080_p10 }
  0x62   : > { %p1083_p9 = pnand %p1082_p7, %p1076_p1 }
  0x64   : > { %1086 = shalt.err (!%p1083_p9)
}
  0x65   : > { %s1087_s18 = scalar_lea.vmem %s1404_s11, 512  ;;  %s1216_s15 = smov [#allocation2]  }
  0x66   : > { %p1088_p12 = scmp.ne.s32.totalorder %s1404_s11, %s1087_s18  ;;  %s1092_s23 = sshll.u32 %s1216_s15, 4  ;;  %s1093_s23 = int_to_ptr.vmem [resolvable:$false] %s1092_s23 }
  0x67   : > { %s1094_s14 = scalar_lea.vmem %s1093_s23, 1024  ;;  %p1095_p4 = scmp.lt.s32.totalorder %s1404_s11, %s1093_s23 }
  0x68   : > { %p1090_p2 = pnand %p1088_p12, %p1074_p0  ;;  %p1096_p13 = scmp.lt.s32.totalorder %s1094_s14, %s1087_s18 }
  0x6a   : > { %p1091_p5 = pneg %p1090_p2  ;;  %p1097_p6 = por %p1096_p13, %p1095_p4 }
  0x6c   : > { %p1098_p10 = pnand %p1097_p6, %p1091_p5 }
  0x6e   : > { %1101 = shalt.err (!%p1098_p10)
}
  0x6f   : > { %s1217_s12 = smov 128   ;;  %s1218_s29 = smov 8  }
  0x70   : > { %945 = dma.hbm_to_vmem [thread:$0]  (!%p1406_p11), %s1401_s20, 512, %s1404_s11, %s1410_s10, %s1217_s12, %s1217_s12, %s1218_s29  }
  0x71   : > { %s1615_s21 = sshll.u32 %s1210_s27, 9  ;;  %s288_s14 = scalar_lea.vmem [#allocation5], %s1393_s19 }
  0x72   : > { %s1446_s23 = scalar_lea.hbm %s1590_s1, %s1615_s21  ;;  %s295_s0 = sshll.u32 %s288_s14, 4  ;;  %s1449_s0 = int_to_ptr.vmem [resolvable:$true] %s295_s0 }
  0x73   : > { %s284_s2 = sand.u32 1, %s1210_s27   ;;  %s1102_s17 = scalar_lea.hbm %s1446_s23, 512 }
  0x74   : > { %s1452_s3 = scalar_lea.sflag [#allocation6], %s284_s2  ;;  %p1103_p4 = scmp.ne.s32.totalorder %s1446_s23, %s1102_s17 }
  0x75   : > { %s1107_s10 = scalar_lea.hbm %s1590_s1, 1024  ;;  %p1108_p3 = scmp.lt.u32.totalorder %s1446_s23, %s1590_s1 }
  0x76   : > { %p1105_p5 = pnand %p1103_p4, %p1074_p0  ;;  %p1109_p7 = scmp.lt.u32.totalorder %s1107_s10, %s1102_s17 }
  0x77   : > { %p1111_p12 = scmp.lt.u32.totalorder %s1102_s17, %s1446_s23 }
  0x78   : > { %p1106_p1 = pneg %p1105_p5  ;;  %p1110_p9 = por %p1109_p7, %p1108_p3 }
  0x7a   : > { %p1112_p2 = por %p1111_p12, %p1110_p9 }
  0x7c   : > { %p1113_p13 = pnand %p1112_p2, %p1106_p1 }
  0x7e   : > { %1116 = shalt.err (!%p1113_p13)
}
  0x7f   : > { %s1117_s2 = scalar_lea.vmem %s1449_s0, 512  ;;  %s1219_s19 = smov [#allocation5]  }
  0x80   : > { %p1118_p6 = scmp.ne.s32.totalorder %s1449_s0, %s1117_s2  ;;  %s1122_s15 = sshll.u32 %s1219_s19, 4  ;;  %s1123_s15 = int_to_ptr.vmem [resolvable:$false] %s1122_s15 }
  0x81   : > { %s1124_s14 = scalar_lea.vmem %s1123_s15, 1024  ;;  %p1125_p5 = scmp.lt.s32.totalorder %s1449_s0, %s1123_s15 }
  0x82   : > { %p1120_p10 = pnand %p1118_p6, %p1074_p0  ;;  %p1126_p3 = scmp.lt.s32.totalorder %s1124_s14, %s1117_s2 }
  0x84   : > { %p1121_p4 = pneg %p1120_p10  ;;  %p1127_p7 = por %p1126_p3, %p1125_p5 }
  0x86   : > { %p1128_p9 = pnand %p1127_p7, %p1121_p4 }
  0x88   : > { %1131 = shalt.err (!%p1128_p9)
}
  0x89   : > { %948 = dma.hbm_to_vmem [thread:$0]  (!%p1406_p11), %s1446_s23, 512, %s1449_s0, %s1452_s3, %s1217_s12, %s1217_s12, %s1218_s29  }
  0x8a   : > { %307 = sbr.rel (%p1304_p8) target bundleno = 466 (0x1d2), region = 48  ;;  %s1484_s17 = sand.u32 (!%p1304_p8), 1, %s1202_s25  }
  0x8b   : > { %s1487_s20 = sshll.u32 (!%p1304_p8), %s1484_s17, 5  ;;  %s310_s22 = scalar_lea.sflag (!%p1304_p8), [#allocation3], %s1484_s17 }
  0x8c   : > { %s1491_s11 = scalar_lea.vmem (!%p1304_p8), [#allocation2], %s1487_s20  ;;  %p1616_p0 = scmp.ne.s32.totalorder (!%p1304_p8), %s1604_s30, 0 }
  0x91   : > { %1177 = dma.done.wait (%p1616_p0), %s310_s22, 512  }
  0x92   : > { %1179 = vsyncadd (%p1616_p0), %s310_s22, 4294966784  ;;  %s318_s0 = sand.u32 1, %s1285_s28   ;;  %s1499_s9 = scalar_lea.vmem [#allocation5], %s1487_s20 }
  0x93   : > { %s319_s3 = scalar_lea.sflag [#allocation6], %s318_s0 }
  0x94   : > { %1181 = dma.done.wait (%p1616_p0), %s319_s3, 512  }
  0x95   : > { %1183 = vsyncadd (%p1616_p0), %s319_s3, 4294966784  ;;  %p1617_p8 = scmp.eq.s32.totalorder %s1285_s28, 0 }
  0x97   : > { %1185 = dma.done.wait (%p1617_p8), [#allocation6], 4096   ;;  %p1618_p11 = pmov %p1617_p8 }
  0x98   : > { %p1619_p1 = pmov %p1617_p8 }
  0x99   : > { %1187 = vsyncadd (%p1618_p11), [#allocation6], 4294963200 }
  0x9a   : > { %1189 = dma.done.wait (%p1619_p1), [#allocation9], 4096   ;;  %p1620_p12 = pmov %p1619_p1 }
  0x9b   : > { %v1220_v0 = vmov 0.0   ;;  %v378_v1 = vld [vmem:[#allocation7 + $0x8] sm:$0xff]  ;;  %v380_v2 = vld [vmem:[#allocation7 + $0x18] sm:$0xff]  ;;  %v377_v6 = vld [vmem:[#allocation7] sm:$0xff]  ;;  %s365_s18 = scalar_lea.vmem [#allocation10], %s1487_s20  ;;  %s856_s2 = sshll.u32 %s1285_s28, 9 }
  0x9c   : > { %1191 = vsyncadd (%p1620_p12), [#allocation9], 4294963200  ;;  %473 = vmatprep.mubr.f32.mxu0 %v1220_v0  ;;  %594 = vmatprep.mubr.f32.mxu1 %v1220_v0  ;;  %v499_v3 = vld [vmem:[#allocation8 + $0x8] sm:$0xff]  ;;  %v857_v4 = vpack.c.bf16 %v380_v2, %v378_v1  ;;  %v501_v5 = vld [vmem:[#allocation8 + $0x18] sm:$0xff]  ;;  %s710_s19 = sshll.u32 %s365_s18, 4  ;;  %s1543_s22 = scalar_lea.hbm %s1596_s7, %s856_s2  ;;  %s1545_s19 = int_to_ptr.vmem [resolvable:$true] %s710_s19 }
  0x9d   : > { %v379_v7 = vld [vmem:[#allocation7 + $0x10] sm:$0xff]  ;;  %v889_v8 = vpack.c.bf16 %v501_v5, %v499_v3  ;;  %v498_v10 = vld [vmem:[#allocation8] sm:$0xff]  ;;  %v382_v12 = vld [vmem:[#allocation7 + $0x28] sm:$0xff]  ;;  %s697_s20 = scalar_lea.sflag [#allocation4], %s1484_s17  ;;  %p1621_p13 = scmp.ne.s32.totalorder %s1611_s16, 0 }
  0x9e   : > { %v859_v9 = vpack.c.bf16 %v379_v7, %v377_v6  ;;  %v500_v11 = vld [vmem:[#allocation8 + $0x10] sm:$0xff]  ;;  %858 = vmatprep.subr.bf16.mxu0 %v857_v4  ;;  %v384_v14 = vld [vmem:[#allocation7 + $0x38] sm:$0xff]  ;;  %v503_v15 = vld [vmem:[#allocation8 + $0x28] sm:$0xff]  ;;  %s1221_s28 = smov [#allocation10]  }
  0x9f   : > { %v891_v13 = vpack.c.bf16 %v500_v11, %v498_v10  ;;  %v505_v16 = vld [vmem:[#allocation8 + $0x38] sm:$0xff]  ;;  %890 = vmatprep.subr.bf16.mxu1 %v889_v8  ;;  %v861_v17 = vpack.c.bf16 %v384_v14, %v382_v12  ;;  %v381_v19 = vld [vmem:[#allocation7 + $0x20] sm:$0xff]  ;;  %v383_v20 = vld [vmem:[#allocation7 + $0x30] sm:$0xff]  ;;  %s1136_s0 = sshll.u32 %s1221_s28, 4  ;;  %s1137_s0 = int_to_ptr.vmem [resolvable:$false] %s1136_s0 }
  0xa0   : > { %860 = vmatpush1.bf16.msra.mxu0 %v859_v9  ;;  %v893_v18 = vpack.c.bf16 %v505_v16, %v503_v15  ;;  %v502_v21 = vld [vmem:[#allocation8 + $0x20] sm:$0xff]  ;;  %v863_v22 = vpack.c.bf16 %v383_v20, %v381_v19  ;;  %v504_v23 = vld [vmem:[#allocation8 + $0x30] sm:$0xff]  ;;  %v386_v24 = vld [vmem:[#allocation7 + $0x48] sm:$0xff]  ;;  %s1138_s3 = scalar_lea.vmem %s1137_s0, 1024  ;;  %p1139_p4 = scmp.lt.s32.totalorder %s1545_s19, %s1137_s0 }
  0xa1   : > { %892 = vmatpush1.bf16.msra.mxu1 %v891_v13  ;;  %v388_v25 = vld [vmem:[#allocation7 + $0x58] sm:$0xff]  ;;  %862 = vmatprep.subr.bf16.mxu0 %v861_v17  ;;  %v895_v26 = vpack.c.bf16 %v504_v23, %v502_v21  ;;  %v507_v28 = vld [vmem:[#allocation8 + $0x48] sm:$0xff]  ;;  %v385_v30 = vld [vmem:[#allocation7 + $0x40] sm:$0xff] }
  0xa2   : > { %894 = vmatprep.subr.bf16.mxu1 %v893_v18  ;;  %v865_v27 = vpack.c.bf16 %v388_v25, %v386_v24  ;;  %v509_v29 = vld [vmem:[#allocation8 + $0x58] sm:$0xff]  ;;  %v387_v32 = vld [vmem:[#allocation7 + $0x50] sm:$0xff]  ;;  %v506_v33 = vld [vmem:[#allocation8 + $0x40] sm:$0xff] }
  0xa3   : > { %v897_v31 = vpack.c.bf16 %v509_v29, %v507_v28  ;;  %v508_v34 = vld [vmem:[#allocation8 + $0x50] sm:$0xff]  ;;  %v867_v35 = vpack.c.bf16 %v387_v32, %v385_v30  ;;  %v390_v36 = vld [vmem:[#allocation7 + $0x68] sm:$0xff]  ;;  %v392_v37 = vld [vmem:[#allocation7 + $0x78] sm:$0xff] }
  0xa4   : > { %864 = vmatpush1.bf16.msra.mxu0 %v863_v22  ;;  %v511_v38 = vld [vmem:[#allocation8 + $0x68] sm:$0xff]  ;;  %v899_v39 = vpack.c.bf16 %v508_v34, %v506_v33  ;;  %v869_v40 = vpack.c.bf16 %v392_v37, %v390_v36  ;;  %v513_v41 = vld [vmem:[#allocation8 + $0x78] sm:$0xff]  ;;  %v389_v42 = vld [vmem:[#allocation7 + $0x60] sm:$0xff] }
  0xa5   : > { %896 = vmatpush1.bf16.msra.mxu1 %v895_v26  ;;  %866 = vmatprep.subr.bf16.mxu0 %v865_v27  ;;  %v391_v43 = vld [vmem:[#allocation7 + $0x70] sm:$0xff]  ;;  %v901_v44 = vpack.c.bf16 %v513_v41, %v511_v38  ;;  %v510_v45 = vld [vmem:[#allocation8 + $0x60] sm:$0xff]  ;;  %v394_v47 = vld [vmem:[#allocation7 + $0x88] sm:$0xff] }
  0xa6   : > { %898 = vmatprep.subr.bf16.mxu1 %v897_v31  ;;  %v512_v46 = vld [vmem:[#allocation8 + $0x70] sm:$0xff]  ;;  %v396_v48 = vld [vmem:[#allocation7 + $0x98] sm:$0xff]  ;;  %v515_v49 = vld [vmem:[#allocation8 + $0x88] sm:$0xff]  ;;  %v871_v51 = vpack.c.bf16 %v391_v43, %v389_v42 }
  0xa7   : > { %v517_v50 = vld [vmem:[#allocation8 + $0x98] sm:$0xff]  ;;  %v903_v52 = vpack.c.bf16 %v512_v46, %v510_v45  ;;  %v873_v53 = vpack.c.bf16 %v396_v48, %v394_v47  ;;  %v393_v54 = vld [vmem:[#allocation7 + $0x80] sm:$0xff]  ;;  %v395_v55 = vld [vmem:[#allocation7 + $0x90] sm:$0xff] }
  0xa8   : > { %868 = vmatpush1.bf16.msra.mxu0 %v867_v35  ;;  %v514_v56 = vld [vmem:[#allocation8 + $0x80] sm:$0xff]  ;;  %v905_v57 = vpack.c.bf16 %v517_v50, %v515_v49  ;;  %v516_v58 = vld [vmem:[#allocation8 + $0x90] sm:$0xff]  ;;  %v398_v59 = vld [vmem:[#allocation7 + $0xa8] sm:$0xff]  ;;  %v875_v63 = vpack.c.bf16 %v395_v55, %v393_v54 }
  0xa9   : > { %900 = vmatpush1.bf16.msra.mxu1 %v899_v39  ;;  %870 = vmatprep.subr.bf16.mxu0 %v869_v40  ;;  %v400_v60 = vld [vmem:[#allocation7 + $0xb8] sm:$0xff]  ;;  %v519_v61 = vld [vmem:[#allocation8 + $0xa8] sm:$0xff]  ;;  %v907_v1 = vpack.c.bf16 %v516_v58, %v514_v56  ;;  %v397_v3 = vld [vmem:[#allocation7 + $0xa0] sm:$0xff] }
  0xaa   : > { %902 = vmatprep.subr.bf16.mxu1 %v901_v44  ;;  %v521_v62 = vld [vmem:[#allocation8 + $0xb8] sm:$0xff]  ;;  %v877_v2 = vpack.c.bf16 %v400_v60, %v398_v59  ;;  %v399_v4 = vld [vmem:[#allocation7 + $0xb0] sm:$0xff]  ;;  %v518_v5 = vld [vmem:[#allocation8 + $0xa0] sm:$0xff] }
  0xab   : > { %v909_v6 = vpack.c.bf16 %v521_v62, %v519_v61  ;;  %v520_v7 = vld [vmem:[#allocation8 + $0xb0] sm:$0xff]  ;;  %v402_v8 = vld [vmem:[#allocation7 + $0xc8] sm:$0xff]  ;;  %v404_v9 = vld [vmem:[#allocation7 + $0xd8] sm:$0xff]  ;;  %v879_v12 = vpack.c.bf16 %v399_v4, %v397_v3 }
  0xac   : > { %872 = vmatpush1.bf16.msra.mxu0 %v871_v51  ;;  %v523_v10 = vld [vmem:[#allocation8 + $0xc8] sm:$0xff]  ;;  %v525_v11 = vld [vmem:[#allocation8 + $0xd8] sm:$0xff]  ;;  %v911_v13 = vpack.c.bf16 %v520_v7, %v518_v5  ;;  %v881_v14 = vpack.c.bf16 %v404_v9, %v402_v8  ;;  %v401_v15 = vld [vmem:[#allocation7 + $0xc0] sm:$0xff] }
  0xad   : > { %904 = vmatpush1.bf16.msra.mxu1 %v903_v52  ;;  %874 = vmatprep.subr.bf16.mxu0 %v873_v53  ;;  %v403_v16 = vld [vmem:[#allocation7 + $0xd0] sm:$0xff]  ;;  %v522_v17 = vld [vmem:[#allocation8 + $0xc0] sm:$0xff]  ;;  %v913_v18 = vpack.c.bf16 %v525_v11, %v523_v10  ;;  %v406_v20 = vld [vmem:[#allocation7 + $0xe8] sm:$0xff] }
  0xae   : > { %906 = vmatprep.subr.bf16.mxu1 %v905_v57  ;;  %v524_v19 = vld [vmem:[#allocation8 + $0xd0] sm:$0xff]  ;;  %v408_v21 = vld [vmem:[#allocation7 + $0xf8] sm:$0xff]  ;;  %v527_v22 = vld [vmem:[#allocation8 + $0xe8] sm:$0xff]  ;;  %v883_v24 = vpack.c.bf16 %v403_v16, %v401_v15 }
  0xaf   : > { %v529_v23 = vld [vmem:[#allocation8 + $0xf8] sm:$0xff]  ;;  %v915_v25 = vpack.c.bf16 %v524_v19, %v522_v17  ;;  %v885_v26 = vpack.c.bf16 %v408_v21, %v406_v20  ;;  %v405_v27 = vld [vmem:[#allocation7 + $0xe0] sm:$0xff]  ;;  %v407_v28 = vld [vmem:[#allocation7 + $0xf0] sm:$0xff] }
  0xb0   : > { %876 = vmatpush1.bf16.msra.mxu0 %v875_v63  ;;  %v917_v29 = vpack.c.bf16 %v529_v23, %v527_v22  ;;  %v526_v30 = vld [vmem:[#allocation8 + $0xe0] sm:$0xff]  ;;  %v528_v31 = vld [vmem:[#allocation8 + $0xf0] sm:$0xff]  ;;  %v887_v32 = vpack.c.bf16 %v407_v28, %v405_v27  ;;  %v370_v36 = vld [vmem:[%s1491_s11 + $0x8] sm:$0xff] }
  0xb1   : > { %908 = vmatpush1.bf16.msra.mxu1 %v907_v1  ;;  %878 = vmatprep.subr.bf16.mxu0 %v877_v2  ;;  %v919_v33 = vpack.c.bf16 %v528_v31, %v526_v30  ;;  %v369_v34 = vld [vmem:[%s1491_s11] sm:$0xff]  ;;  %v374_v37 = vld [vmem:[%s1499_s9 + $0x8] sm:$0xff]  ;;  %v371_v38 = vld [vmem:[%s1491_s11 + $0x10] sm:$0xff] }
  0xb2   : > { %910 = vmatprep.subr.bf16.mxu1 %v909_v6  ;;  %v373_v35 = vld [vmem:[%s1499_s9] sm:$0xff]  ;;  %v375_v39 = vld [vmem:[%s1499_s9 + $0x10] sm:$0xff]  ;;  %v372_v40 = vld [vmem:[%s1491_s11 + $0x18] sm:$0xff]  ;;  %s1132_s11 = scalar_lea.vmem %s1545_s19, 512 }
  0xb3   : > { %v376_v41 = vld [vmem:[%s1499_s9 + $0x18] sm:$0xff]  ;;  %v842_v42 = vld [vmem:[%s1593_s4] ss:$0 sm:$0xff]  ;;  %p1133_p2 = scmp.ne.s32.totalorder %s1545_s19, %s1132_s11  ;;  %p1140_p5 = scmp.lt.s32.totalorder %s1138_s3, %s1132_s11 }
  0xb4   : > { %880 = vmatpush1.bf16.msra.mxu0 %v879_v12  ;;  %v843_v43 = vld [vmem:[%s1594_s5] ss:$0 sm:$0xff] }
  0xb5   : > { %912 = vmatpush1.bf16.msra.mxu1 %v911_v13  ;;  %882 = vmatprep.subr.bf16.mxu0 %v881_v14  ;;  %p1134_p6 = pnand %p1133_p2, %p1621_p13  ;;  %p1141_p3 = por %p1140_p5, %p1139_p4 }
  0xb6   : > { %914 = vmatprep.subr.bf16.mxu1 %v913_v18 }
  0xb7   : > { %p1135_p10 = pneg %p1134_p6 }
  0xb8   : > { %884 = vmatpush1.bf16.msra.mxu0 %v883_v24 }
  0xb9   : > { %916 = vmatpush1.bf16.msra.mxu1 %v915_v25  ;;  %886 = vmatprep.subr.bf16.mxu0 %v885_v26  ;;  %p1142_p7 = pnand %p1141_p3, %p1135_p10 }
  0xba   : > { %918 = vmatprep.subr.bf16.mxu1 %v917_v29 }
  0xbc   : > { %888 = vmatpush1.bf16.msra.mxu0 %v887_v32 }
  0xbd   : > { %920 = vmatpush1.bf16.msra.mxu1 %v919_v33 }
  0xbf   : > { %474 = vmatmul.mubr.f32.vlgmr.msra.gmra.mrb[0].mxu0 %v369_v34 }
  0xc0   : > { %595 = vmatmul.mubr.f32.vlgmr.msra.gmra.mrb[0].mxu1 %v373_v35  ;;  %479 = vmatprep.mubr.f32.mxu0 %v1220_v0 }
  0xc1   : > { %600 = vmatprep.mubr.f32.mxu1 %v1220_v0 }
  0xc3   : > { %480 = vmatmul.mubr.f32.gmra.mrb[2].mxu0 %v370_v36 }
  0xc4   : > { %601 = vmatmul.mubr.f32.gmra.mrb[2].mxu1 %v374_v37  ;;  %485 = vmatprep.mubr.f32.mxu0 %v1220_v0 }
  0xc5   : > { %606 = vmatprep.mubr.f32.mxu1 %v1220_v0 }
  0xc7   : > { %486 = vmatmul.mubr.f32.gmra.mrb[4].mxu0 %v371_v38 }
  0xc8   : > { %607 = vmatmul.mubr.f32.gmra.mrb[4].mxu1 %v375_v39  ;;  %491 = vmatprep.mubr.f32.mxu0 %v1220_v0 }
  0xc9   : > { %612 = vmatprep.mubr.f32.mxu1 %v1220_v0  ;;  %v844_v0 = vld [vmem:[%s1595_s6] ss:$0 sm:$0xff] }
  0xcb   : > { %492 = vmatmul.mubr.f32.gmra.mrb[6].mxu0 %v372_v40 }
  0xcc   : > { %613 = vmatmul.mubr.f32.gmra.mrb[6].mxu1 %v376_v41 }
 0x192   : > { %v475_v44 = vpop.f32.mrb[0].mxu0 }
 0x193   : > { %v626_v45 = vadd.f32 %v842_v42, %v475_v44  ;;  %v596_v46 = vpop.f32.mrb[0].mxu1  ;;  %v477_v47 = vpop.f32.mrb[1].mxu0 }
 0x194   : > { %v637_v48 = vadd.f32 %v843_v43, %v596_v46  ;;  %v598_v49 = vpop.f32.mrb[1].mxu1 }
 0x195   : > { %v641_v50 = vadd.f32 %v598_v49, %v477_v47 }
 0x196   : > { %v680_v51 = vsub.f32 %v626_v45, %v637_v48  ;;  %v481_v52 = vpop.f32.mrb[2].mxu0 }
 0x197   : > { %v652_v53 = vadd.f32 %v844_v0, %v641_v50  ;;  %v627_v54 = vadd.f32 %v842_v42, %v481_v52  ;;  %v602_v55 = vpop.f32.mrb[2].mxu1  ;;  %v483_v56 = vpop.f32.mrb[3].mxu0 }
 0x198   : > { %v638_v57 = vadd.f32 %v843_v43, %v602_v55  ;;  %v604_v58 = vpop.f32.mrb[3].mxu1 }
 0x199   : > { %v845_v59 = vmul.f32 -1.442695, %v652_v53  ;;  %v642_v60 = vadd.f32 %v604_v58, %v483_v56 }
 0x19a   : > { %v681_v61 = vsub.f32 %v627_v54, %v638_v57  ;;  %v487_v62 = vpop.f32.mrb[4].mxu0 }
 0x19b   : > { %1000 = vpow2.f32 %v845_v59  ;;  %v653_v63 = vadd.f32 %v844_v0, %v642_v60  ;;  %v628_v1 = vadd.f32 %v842_v42, %v487_v62  ;;  %v608_v2 = vpop.f32.mrb[4].mxu1  ;;  %v489_v3 = vpop.f32.mrb[5].mxu0 }
 0x19c   : > { %v639_v4 = vadd.f32 %v843_v43, %v608_v2  ;;  %v610_v5 = vpop.f32.mrb[5].mxu1 }
 0x19d   : > { %v846_v6 = vmul.f32 -1.442695, %v653_v63  ;;  %v643_v7 = vadd.f32 %v610_v5, %v489_v3 }
 0x19e   : > { %v682_v8 = vsub.f32 %v628_v1, %v639_v4  ;;  %v493_v9 = vpop.f32.mrb[6].mxu0 }
 0x19f   : > { %1002 = vpow2.f32 %v846_v6  ;;  %v654_v10 = vadd.f32 %v844_v0, %v643_v7  ;;  %v629_v11 = vadd.f32 %v842_v42, %v493_v9  ;;  %v614_v12 = vpop.f32.mrb[6].mxu1  ;;  %v495_v13 = vpop.f32.mrb[7].mxu0 }
 0x1a0   : > { %v640_v14 = vadd.f32 %v843_v43, %v614_v12  ;;  %v616_v15 = vpop.f32.mrb[7].mxu1 }
 0x1a1   : > { %v847_v16 = vmul.f32 -1.442695, %v654_v10  ;;  %v644_v17 = vadd.f32 %v616_v15, %v495_v13 }
 0x1a2   : > { %v683_v18 = vsub.f32 %v629_v11, %v640_v14 }
 0x1a3   : > { %1004 = vpow2.f32 %v847_v16  ;;  %v655_v19 = vadd.f32 %v844_v0, %v644_v17 }
 0x1a5   : > { %v1001_v20 = vpop.eup %1000  ;;  %v848_v21 = vmul.f32 -1.442695, %v655_v19 }
 0x1a6   : > { %v668_v22 = vadd.f32 1.0, %v1001_v20 }
 0x1a7   : > { %1006 = vpow2.f32 %v848_v21 }
 0x1a8   : > { %1008 = vrcp.f32 %v668_v22 }
 0x1a9   : > { %v1003_v23 = vpop.eup %1002 }
 0x1aa   : > { %v669_v24 = vadd.f32 1.0, %v1003_v23 }
 0x1ac   : > { %1010 = vrcp.f32 %v669_v24 }
 0x1ad   : > { %v1005_v25 = vpop.eup %1004 }
 0x1ae   : > { %v670_v26 = vadd.f32 1.0, %v1005_v25 }
 0x1b0   : > { %1012 = vrcp.f32 %v670_v26 }
 0x1b1   : > { %v1007_v27 = vpop.eup %1006 }
 0x1b2   : > { %v1009_v28 = vpop.eup %1008  ;;  %v671_v29 = vadd.f32 1.0, %v1007_v27 }
 0x1b3   : > { %v684_v30 = vmul.f32 %v1009_v28, %v680_v51 }
 0x1b4   : > { %1014 = vrcp.f32 %v671_v29 }
 0x1b5   : > { %v688_v31 = vadd.f32 %v684_v30, %v637_v48 }
 0x1b6   : > { %v1011_v32 = vpop.eup %1010 }
 0x1b7   : > { %692 = vst [vmem:[%s365_s18] sm:$0xff] %v688_v31  ;;  %v685_v33 = vmul.f32 %v1011_v32, %v681_v61 }
 0x1b9   : > { %v689_v34 = vadd.f32 %v685_v33, %v638_v57 }
 0x1ba   : > { %v1013_v35 = vpop.eup %1012 }
 0x1bb   : > { %693 = vst [vmem:[%s365_s18 + $0x8] sm:$0xff] %v689_v34  ;;  %v686_v36 = vmul.f32 %v1013_v35, %v682_v8 }
 0x1bd   : > { %v690_v37 = vadd.f32 %v686_v36, %v639_v4 }
 0x1be   : > { %v1015_v38 = vpop.eup %1014 }
 0x1bf   : > { %694 = vst [vmem:[%s365_s18 + $0x10] sm:$0xff] %v690_v37  ;;  %v687_v39 = vmul.f32 %v1015_v38, %v683_v18 }
 0x1c1   : > { %v691_v40 = vadd.f32 %v687_v39, %v640_v14 }
 0x1c3   : > { %695 = vst [vmem:[%s365_s18 + $0x18] sm:$0xff] %v691_v40 }
 0x1c4   : > { %1145 = shalt.err (!%p1142_p7)
}
 0x1c5   : > { %s1146_s9 = scalar_lea.hbm %s1543_s22, 512  ;;  %s1150_s29 = scalar_lea.hbm %s1596_s7, 1024 }
 0x1c6   : > { %p1147_p9 = scmp.ne.s32.totalorder %s1543_s22, %s1146_s9  ;;  %p1151_p11 = scmp.lt.u32.totalorder %s1543_s22, %s1596_s7 }
 0x1c7   : > { %p1152_p1 = scmp.lt.u32.totalorder %s1150_s29, %s1146_s9  ;;  %p1154_p2 = scmp.lt.u32.totalorder %s1146_s9, %s1543_s22 }
 0x1c8   : > { %p1148_p0 = pnand %p1147_p9, %p1621_p13 }
 0x1c9   : > { %p1153_p12 = por %p1152_p1, %p1151_p11 }
 0x1ca   : > { %p1149_p8 = pneg %p1148_p0 }
 0x1cb   : > { %p1155_p6 = por %p1154_p2, %p1153_p12 }
 0x1cd   : > { %p1156_p10 = pnand %p1155_p6, %p1149_p8 }
 0x1cf   : > { %1159 = shalt.err (!%p1156_p10)
}
 0x1d0   : > { %s1222_s21 = smov 128   ;;  %s1223_s18 = smov 8  }
 0x1d1   : > { %933 = dma.vmem_to_hbm [thread:$0]  (%p1621_p13), %s1545_s19, 512, %s1543_s22, %s697_s20, %s1222_s21, %s1222_s21, %s1223_s18  }
 0x1d2 PF: > { %s725_s2 = sand.u32 1, %s1198_s24   ;;  %p1622_p4 = scmp.ne.s32.totalorder %s1605_s8, 0 }
 0x1d3   : > { %p1623_p5 = scmp.ge.s32.totalorder %s1210_s27, 2  ;;  %s726_s15 = scalar_lea.sflag [#allocation4], %s725_s2 }
 0x1d5   : > { %p950_p3 = pnand %p1623_p5, %p1622_p4 }
 0x1d7   : > { %1193 = dma.done.wait (!%p950_p3), %s726_s15, 512  }
 0x1d8   : > { %1195 = vsyncadd (!%p950_p3), %s726_s15, 4294966784  ;;  %s1624_s14 = sld [smem:[#allocation16_spill]]  ;;  %p24_p7 = scmp.ge.s32.totalorder %s1374_s13, 4  }
 0x1d9   : > { %s1625_s24 = smov %s1202_s25  ;;  %s1626_s25 = smov %s1206_s26 }
 0x1da   : > { %s1628_s27 = smov %s1374_s13  ;;  %26 = sbr.rel (!%p24_p7) target bundleno = 12 (0xc), region = 114 }
 0x1de   : > { %s1627_s26 = smov %s1624_s14 }
 0x1e1   :  { %731 = vsyncpa [#allocation3], 1 }
 0x1e2   :  { %733 = vsyncpa [#allocation3 + $0x1], 1 }
 0x1e3   :  { %734 = vsyncpa [#allocation6], 1 }
 0x1e4   :  { %736 = vsyncpa [#allocation6 + $0x1], 1 }
 0x1e5   :  { %737 = vsyncpa [#allocation9], 1 }
 0x1e6   :  { %738 = vsyncpa [#allocation4], 1 }
 0x1e7   :  { %740 = vsyncpa [#allocation4 + $0x1], 1 }

// kernel: tpu_custom_call.1
= control target key start
LH: loop header
LB: loop body
LE: loop exit
PB: predicated region body
PF: predicated region fallthrough
CT: control target
= control target key end

     0   :  { %s1589_s0 = inlined_call_operand.hbm [shape: f32[64,128], index: 0, kind: input, shape index: {}]   ;;  %s1590_s1 = inlined_call_operand.hbm [shape: f32[64,128], index: 1, kind: input, shape index: {}]   ;;  %s1591_s2 = inlined_call_operand.hbm [shape: f32[128,256], index: 2, kind: input, shape index: {}]   ;;  %s1592_s3 = inlined_call_operand.hbm [shape: f32[128,256], index: 3, kind: input, shape index: {}]   ;;  %s1593_s4 = inlined_call_operand.vmem [shape: f32[1,128], index: 4, kind: input, shape index: {}]   ;;  %s1594_s5 = inlined_call_operand.vmem [shape: f32[1,128], index: 5, kind: input, shape index: {}]   ;;  %s1595_s6 = inlined_call_operand.vmem [shape: f32[1,128], index: 6, kind: input, shape index: {}]   ;;  %s1596_s7 = inlined_call_operand.hbm [shape: f32[64,128], index: 7, kind: output, shape index: {}]  }
   0x1   :  { %1601 = sst [smem:[#allocation17_spill]] %s1589_s0 }
   0x2   :  { %1602 = sst [smem:[#allocation18_spill]] %s1591_s2 }
   0x3   :  { %1603 = sst [smem:[#allocation19_spill]] %s1592_s3 }
   0x4   :  { %12 = vsyncpa [#allocation3], 0 }
   0x5   :  { %14 = vsyncpa [#allocation3 + $0x1], 0 }
   0x6   :  { %15 = vsyncpa [#allocation6], 0 }
   0x7   :  { %17 = vsyncpa [#allocation6 + $0x1], 0 }
   0x8   :  { %18 = vsyncpa [#allocation9], 0 }
   0x9   :  { %19 = vsyncpa [#allocation4], 0 }
   0xa   :  { %21 = vsyncpa [#allocation4 + $0x1], 0  ;;  %s1264_s24 = smov 0   ;;  %s1266_s25 = smov 0  }
   0xb   :  { %s1268_s26 = smov 0   ;;  %s1270_s27 = smov 0  }
   0xc LB: > { %s1285_s28 = sadd.s32 4294967295, %s1210_s27   ;;  %s825_s29 = sadd.s32 4294967294, %s1210_s27   ;;  %s1210_s27 = sphi %s1270_s27, %s1628_s27   ;;  %s1206_s26 = sphi %s1268_s26, %s1627_s26   ;;  %s1202_s25 = sphi %s1266_s25, %s1626_s25   ;;  %s1198_s24 = sphi %s1264_s24, %s1625_s24  }
   0xd   : > { %p47_p0 = scmp.ne.s32.totalorder %s1202_s25, %s1198_s24  ;;  %p1597_p1 = scmp.eq.s32.totalorder %s1285_s28, 0 }
   0xe   : > { %p208_p3 = scmp.eq.s32.totalorder %s825_s29, 1  ;;  %p826_p5 = scmp.ge.s32.totalorder %s1210_s27, 1 }
   0xf   : > { %p1294_p4 = por %p1597_p1, %p47_p0  ;;  %p215_p7 = scmp.lt.s32.totalorder %s1210_s27, 3 }
  0x10   : > { %p1299_p6 = por %p208_p3, %p47_p0  ;;  %s1212_s10 = smov [#allocation7]  }
  0x11   : > { %s1604_s30 = scalar_select %p1294_p4, 1, 0 }
  0x12   : > { %s1605_s8 = scalar_select %p1299_p6, 1, 0 }
  0x13   : > { %p1304_p8 = pnand %p826_p5, %p215_p7  ;;  %s227_s11 = sshll.u32 %s1212_s10, 4  ;;  %s1308_s11 = int_to_ptr.vmem [resolvable:$true] %s227_s11 }
  0x14   : > { %s1213_s13 = smov [#allocation8]   ;;  %s1608_s2 = sld [smem:[#allocation18_spill]] }
  0x15   : > { %p935_p9 = pneg %p1304_p8  ;;  %s240_s14 = sshll.u32 %s1213_s13, 4  ;;  %s1319_s14 = int_to_ptr.vmem [resolvable:$true] %s240_s14 }
  0x17   : > { %p1315_p11 = pnand %p935_p9, %p1597_p1 }
  0x19   : > { %p1018_p13 = pneg %p1315_p11 }
  0x1a   : > { %s1016_s17 = scalar_lea.hbm %s1608_s2, 4096 }
  0x1b   : > { %p1017_p12 = scmp.ne.s32.totalorder %s1608_s2, %s1016_s17  ;;  %p1023_p5 = scmp.lt.u32.totalorder %s1016_s17, %s1608_s2 }
  0x1d   : > { %p1019_p0 = pnand %p1018_p13, %p1017_p12 }
  0x1f   : > { %p1020_p3 = pneg %p1019_p0 }
  0x21   : > { %p1025_p7 = pnand %p1023_p5, %p1020_p3 }
  0x23   : > { %1028 = shalt.err (!%p1025_p7)
}
  0x24   : > { %s1029_s22 = scalar_lea.vmem %s1308_s11, 4096  ;;  %p1037_p2 = scmp.lt.s32.totalorder %s1308_s11, %s1308_s11 }
  0x25   : > { %p1030_p9 = scmp.ne.s32.totalorder %s1308_s11, %s1029_s22  ;;  %p1038_p12 = scmp.lt.s32.totalorder %s1029_s22, %s1029_s22 }
  0x27   : > { %p1032_p10 = pnand %p1030_p9, %p1018_p13  ;;  %p1039_p0 = por %p1038_p12, %p1037_p2 }
  0x29   : > { %p1033_p1 = pneg %p1032_p10 }
  0x2b   : > { %p1040_p6 = pnand %p1039_p0, %p1033_p1 }
  0x2d   : > { %1043 = shalt.err (!%p1040_p6)
}
  0x2e   : > { %s1214_s23 = smov 256   ;;  %s1215_s29 = smov 16  }
  0x2f   : > { %938 = dma.hbm_to_vmem [thread:$0]  (!%p1315_p11), %s1608_s2, 4096, %s1308_s11, [#allocation6], %s1214_s23, %s1214_s23, %s1215_s29  }
  0x30   : > { %s1609_s3 = sld [smem:[#allocation19_spill]] }
  0x36   : > { %s1044_s17 = scalar_lea.hbm %s1609_s3, 4096 }
  0x37   : > { %p1045_p2 = scmp.ne.s32.totalorder %s1609_s3, %s1044_s17  ;;  %p1051_p10 = scmp.lt.u32.totalorder %s1044_s17, %s1609_s3 }
  0x39   : > { %p1047_p1 = pnand %p1045_p2, %p1018_p13 }
  0x3b   : > { %p1048_p6 = pneg %p1047_p1 }
  0x3d   : > { %p1053_p3 = pnand %p1051_p10, %p1048_p6 }
  0x3f   : > { %1056 = shalt.err (!%p1053_p3)
}
  0x40   : > { %s1057_s11 = scalar_lea.vmem %s1319_s14, 4096  ;;  %p1065_p12 = scmp.lt.s32.totalorder %s1319_s14, %s1319_s14 }
  0x41   : > { %p1058_p5 = scmp.ne.s32.totalorder %s1319_s14, %s1057_s11  ;;  %p1066_p0 = scmp.lt.s32.totalorder %s1057_s11, %s1057_s11 }
  0x43   : > { %p1060_p7 = pnand %p1058_p5, %p1018_p13  ;;  %p1067_p2 = por %p1066_p0, %p1065_p12 }
  0x45   : > { %p1061_p9 = pneg %p1060_p7 }
  0x47   : > { %p1068_p1 = pnand %p1067_p2, %p1061_p9 }
  0x49   : > { %1071 = shalt.err (!%p1068_p1)
}
  0x4a   : > { %941 = dma.hbm_to_vmem [thread:$0]  (!%p1315_p11), %s1609_s3, 4096, %s1319_s14, [#allocation9], %s1214_s23, %s1214_s23, %s1215_s29  }
  0x4b   : > { %s1374_s13 = sadd.s32 1, %s1210_s27   ;;  %s34_s12 = sadd.s32 1, %s1206_s26 }
  0x4c   : > { %s31_s15 = ssub.s32 %s1210_s27, %s1374_s13  ;;  %p41_p13 = scmp.ne.s32.totalorder %s1206_s26, %s1202_s25 }
  0x4d   : > { %p32_p6 = scmp.eq.s32.totalorder %s31_s15, 0  ;;  %p42_p10 = scmp.eq.s32.totalorder %s1210_s27, 0 }
  0x4e   : > { %p1610_p3 = scmp.eq.s32.totalorder %s1285_s28, 1  ;;  %p955_p7 = scmp.lt.s32.totalorder %s1210_s27, 2 }
  0x4f   : > { %s1390_s17 = scalar_select %p32_p6, %s1206_s26, %s34_s12  }
  0x50   : > { %p1384_p5 = por %p1610_p3, %p41_p13  ;;  %p43_p9 = por %p42_p10, %p41_p13 }
  0x51   : > { %1612 = sst [smem:[#allocation16_spill]] %s1390_s17  ;;  %s263_s18 = sand.u32 1, %s1206_s26  }
  0x52   : > { %s1611_s16 = scalar_select %p1384_p5, 1, 0 }
  0x53   : > { %s1393_s19 = sshll.u32 %s263_s18, 5  ;;  %s1598_s14 = sshll.u32 %s1210_s27, 9 }
  0x54   : > { %s1613_s0 = sld [smem:[#allocation17_spill]]  ;;  %s267_s21 = scalar_lea.vmem [#allocation2], %s1393_s19 }
  0x55   : > { %s274_s11 = sshll.u32 %s267_s21, 4  ;;  %p1406_p11 = pnand %p955_p7, %p43_p9  ;;  %s1404_s11 = int_to_ptr.vmem [resolvable:$true] %s274_s11 }
  0x56   : > { %s1410_s10 = scalar_lea.sflag [#allocation3], %s263_s18 }
  0x57   : > { %p1074_p0 = pneg %p1406_p11 }
  0x5a   : > { %s1401_s20 = scalar_lea.hbm %s1613_s0, %s1598_s14  ;;  %s1077_s29 = scalar_lea.hbm %s1613_s0, 1024 }
  0x5b   : > { %s1072_s12 = scalar_lea.hbm %s1401_s20, 512  ;;  %p1078_p13 = scmp.lt.u32.totalorder %s1401_s20, %s1613_s0 }
  0x5c   : > { %p1073_p12 = scmp.ne.s32.totalorder %s1401_s20, %s1072_s12  ;;  %p1079_p6 = scmp.lt.u32.totalorder %s1077_s29, %s1072_s12 }
  0x5d   : > { %p1081_p3 = scmp.lt.u32.totalorder %s1072_s12, %s1401_s20 }
  0x5e   : > { %p1075_p2 = pnand %p1074_p0, %p1073_p12  ;;  %p1080_p10 = por %p1079_p6, %p1078_p13 }
  0x60   : > { %p1076_p1 = pneg %p1075_p2  ;;  %p1082_p7 = por %p1081_p3, %p1080_p10 }
  0x62   : > { %p1083_p9 = pnand %p1082_p7, %p1076_p1 }
  0x64   : > { %1086 = shalt.err (!%p1083_p9)
}
  0x65   : > { %s1087_s18 = scalar_lea.vmem %s1404_s11, 512  ;;  %s1216_s15 = smov [#allocation2]  }
  0x66   : > { %p1088_p12 = scmp.ne.s32.totalorder %s1404_s11, %s1087_s18  ;;  %s1092_s23 = sshll.u32 %s1216_s15, 4  ;;  %s1093_s23 = int_to_ptr.vmem [resolvable:$false] %s1092_s23 }
  0x67   : > { %s1094_s14 = scalar_lea.vmem %s1093_s23, 1024  ;;  %p1095_p4 = scmp.lt.s32.totalorder %s1404_s11, %s1093_s23 }
  0x68   : > { %p1090_p2 = pnand %p1088_p12, %p1074_p0  ;;  %p1096_p13 = scmp.lt.s32.totalorder %s1094_s14, %s1087_s18 }
  0x6a   : > { %p1091_p5 = pneg %p1090_p2  ;;  %p1097_p6 = por %p1096_p13, %p1095_p4 }
  0x6c   : > { %p1098_p10 = pnand %p1097_p6, %p1091_p5 }
  0x6e   : > { %1101 = shalt.err (!%p1098_p10)
}
  0x6f   : > { %s1217_s12 = smov 128   ;;  %s1218_s29 = smov 8  }
  0x70   : > { %945 = dma.hbm_to_vmem [thread:$0]  (!%p1406_p11), %s1401_s20, 512, %s1404_s11, %s1410_s10, %s1217_s12, %s1217_s12, %s1218_s29  }
  0x71   : > { %s1615_s21 = sshll.u32 %s1210_s27, 9  ;;  %s288_s14 = scalar_lea.vmem [#allocation5], %s1393_s19 }
  0x72   : > { %s1446_s23 = scalar_lea.hbm %s1590_s1, %s1615_s21  ;;  %s295_s0 = sshll.u32 %s288_s14, 4  ;;  %s1449_s0 = int_to_ptr.vmem [resolvable:$true] %s295_s0 }
  0x73   : > { %s284_s2 = sand.u32 1, %s1210_s27   ;;  %s1102_s17 = scalar_lea.hbm %s1446_s23, 512 }
  0x74   : > { %s1452_s3 = scalar_lea.sflag [#allocation6], %s284_s2  ;;  %p1103_p4 = scmp.ne.s32.totalorder %s1446_s23, %s1102_s17 }
  0x75   : > { %s1107_s10 = scalar_lea.hbm %s1590_s1, 1024  ;;  %p1108_p3 = scmp.lt.u32.totalorder %s1446_s23, %s1590_s1 }
  0x76   : > { %p1105_p5 = pnand %p1103_p4, %p1074_p0  ;;  %p1109_p7 = scmp.lt.u32.totalorder %s1107_s10, %s1102_s17 }
  0x77   : > { %p1111_p12 = scmp.lt.u32.totalorder %s1102_s17, %s1446_s23 }
  0x78   : > { %p1106_p1 = pneg %p1105_p5  ;;  %p1110_p9 = por %p1109_p7, %p1108_p3 }
  0x7a   : > { %p1112_p2 = por %p1111_p12, %p1110_p9 }
  0x7c   : > { %p1113_p13 = pnand %p1112_p2, %p1106_p1 }
  0x7e   : > { %1116 = shalt.err (!%p1113_p13)
}
  0x7f   : > { %s1117_s2 = scalar_lea.vmem %s1449_s0, 512  ;;  %s1219_s19 = smov [#allocation5]  }
  0x80   : > { %p1118_p6 = scmp.ne.s32.totalorder %s1449_s0, %s1117_s2  ;;  %s1122_s15 = sshll.u32 %s1219_s19, 4  ;;  %s1123_s15 = int_to_ptr.vmem [resolvable:$false] %s1122_s15 }
  0x81   : > { %s1124_s14 = scalar_lea.vmem %s1123_s15, 1024  ;;  %p1125_p5 = scmp.lt.s32.totalorder %s1449_s0, %s1123_s15 }
  0x82   : > { %p1120_p10 = pnand %p1118_p6, %p1074_p0  ;;  %p1126_p3 = scmp.lt.s32.totalorder %s1124_s14, %s1117_s2 }
  0x84   : > { %p1121_p4 = pneg %p1120_p10  ;;  %p1127_p7 = por %p1126_p3, %p1125_p5 }
  0x86   : > { %p1128_p9 = pnand %p1127_p7, %p1121_p4 }
  0x88   : > { %1131 = shalt.err (!%p1128_p9)
}
  0x89   : > { %948 = dma.hbm_to_vmem [thread:$0]  (!%p1406_p11), %s1446_s23, 512, %s1449_s0, %s1452_s3, %s1217_s12, %s1217_s12, %s1218_s29  }
  0x8a   : > { %307 = sbr.rel (%p1304_p8) target bundleno = 466 (0x1d2), region = 48  ;;  %s1484_s17 = sand.u32 (!%p1304_p8), 1, %s1202_s25  }
  0x8b   : > { %s1487_s20 = sshll.u32 (!%p1304_p8), %s1484_s17, 5  ;;  %s310_s22 = scalar_lea.sflag (!%p1304_p8), [#allocation3], %s1484_s17 }
  0x8c   : > { %s1491_s11 = scalar_lea.vmem (!%p1304_p8), [#allocation2], %s1487_s20  ;;  %p1616_p0 = scmp.ne.s32.totalorder (!%p1304_p8), %s1604_s30, 0 }
  0x91   : > { %1177 = dma.done.wait (%p1616_p0), %s310_s22, 512  }
  0x92   : > { %1179 = vsyncadd (%p1616_p0), %s310_s22, 4294966784  ;;  %s318_s0 = sand.u32 1, %s1285_s28   ;;  %s1499_s9 = scalar_lea.vmem [#allocation5], %s1487_s20 }
  0x93   : > { %s319_s3 = scalar_lea.sflag [#allocation6], %s318_s0 }
  0x94   : > { %1181 = dma.done.wait (%p1616_p0), %s319_s3, 512  }
  0x95   : > { %1183 = vsyncadd (%p1616_p0), %s319_s3, 4294966784  ;;  %p1617_p8 = scmp.eq.s32.totalorder %s1285_s28, 0 }
  0x97   : > { %1185 = dma.done.wait (%p1617_p8), [#allocation6], 4096   ;;  %p1618_p11 = pmov %p1617_p8 }
  0x98   : > { %p1619_p1 = pmov %p1617_p8 }
  0x99   : > { %1187 = vsyncadd (%p1618_p11), [#allocation6], 4294963200 }
  0x9a   : > { %1189 = dma.done.wait (%p1619_p1), [#allocation9], 4096   ;;  %p1620_p12 = pmov %p1619_p1 }
  0x9b   : > { %v1220_v0 = vmov 0.0   ;;  %v378_v1 = vld [vmem:[#allocation7 + $0x8] sm:$0xff]  ;;  %v380_v2 = vld [vmem:[#allocation7 + $0x18] sm:$0xff]  ;;  %v377_v6 = vld [vmem:[#allocation7] sm:$0xff]  ;;  %s365_s18 = scalar_lea.vmem [#allocation10], %s1487_s20  ;;  %s856_s2 = sshll.u32 %s1285_s28, 9 }
  0x9c   : > { %1191 = vsyncadd (%p1620_p12), [#allocation9], 4294963200  ;;  %473 = vmatprep.mubr.f32.mxu0 %v1220_v0  ;;  %594 = vmatprep.mubr.f32.mxu1 %v1220_v0  ;;  %v499_v3 = vld [vmem:[#allocation8 + $0x8] sm:$0xff]  ;;  %v857_v4 = vpack.c.bf16 %v380_v2, %v378_v1  ;;  %v501_v5 = vld [vmem:[#allocation8 + $0x18] sm:$0xff]  ;;  %s710_s19 = sshll.u32 %s365_s18, 4  ;;  %s1543_s22 = scalar_lea.hbm %s1596_s7, %s856_s2  ;;  %s1545_s19 = int_to_ptr.vmem [resolvable:$true] %s710_s19 }
  0x9d   : > { %v379_v7 = vld [vmem:[#allocation7 + $0x10] sm:$0xff]  ;;  %v889_v8 = vpack.c.bf16 %v501_v5, %v499_v3  ;;  %v498_v10 = vld [vmem:[#allocation8] sm:$0xff]  ;;  %v382_v12 = vld [vmem:[#allocation7 + $0x28] sm:$0xff]  ;;  %s697_s20 = scalar_lea.sflag [#allocation4], %s1484_s17  ;;  %p1621_p13 = scmp.ne.s32.totalorder %s1611_s16, 0 }
  0x9e   : > { %v859_v9 = vpack.c.bf16 %v379_v7, %v377_v6  ;;  %v500_v11 = vld [vmem:[#allocation8 + $0x10] sm:$0xff]  ;;  %858 = vmatprep.subr.bf16.mxu0 %v857_v4  ;;  %v384_v14 = vld [vmem:[#allocation7 + $0x38] sm:$0xff]  ;;  %v503_v15 = vld [vmem:[#allocation8 + $0x28] sm:$0xff]  ;;  %s1221_s28 = smov [#allocation10]  }
  0x9f   : > { %v891_v13 = vpack.c.bf16 %v500_v11, %v498_v10  ;;  %v505_v16 = vld [vmem:[#allocation8 + $0x38] sm:$0xff]  ;;  %890 = vmatprep.subr.bf16.mxu1 %v889_v8  ;;  %v861_v17 = vpack.c.bf16 %v384_v14, %v382_v12  ;;  %v381_v19 = vld [vmem:[#allocation7 + $0x20] sm:$0xff]  ;;  %v383_v20 = vld [vmem:[#allocation7 + $0x30] sm:$0xff]  ;;  %s1136_s0 = sshll.u32 %s1221_s28, 4  ;;  %s1137_s0 = int_to_ptr.vmem [resolvable:$false] %s1136_s0 }
  0xa0   : > { %860 = vmatpush1.bf16.msra.mxu0 %v859_v9  ;;  %v893_v18 = vpack.c.bf16 %v505_v16, %v503_v15  ;;  %v502_v21 = vld [vmem:[#allocation8 + $0x20] sm:$0xff]  ;;  %v863_v22 = vpack.c.bf16 %v383_v20, %v381_v19  ;;  %v504_v23 = vld [vmem:[#allocation8 + $0x30] sm:$0xff]  ;;  %v386_v24 = vld [vmem:[#allocation7 + $0x48] sm:$0xff]  ;;  %s1138_s3 = scalar_lea.vmem %s1137_s0, 1024  ;;  %p1139_p4 = scmp.lt.s32.totalorder %s1545_s19, %s1137_s0 }
  0xa1   : > { %892 = vmatpush1.bf16.msra.mxu1 %v891_v13  ;;  %v388_v25 = vld [vmem:[#allocation7 + $0x58] sm:$0xff]  ;;  %862 = vmatprep.subr.bf16.mxu0 %v861_v17  ;;  %v895_v26 = vpack.c.bf16 %v504_v23, %v502_v21  ;;  %v507_v28 = vld [vmem:[#allocation8 + $0x48] sm:$0xff]  ;;  %v385_v30 = vld [vmem:[#allocation7 + $0x40] sm:$0xff] }
  0xa2   : > { %894 = vmatprep.subr.bf16.mxu1 %v893_v18  ;;  %v865_v27 = vpack.c.bf16 %v388_v25, %v386_v24  ;;  %v509_v29 = vld [vmem:[#allocation8 + $0x58] sm:$0xff]  ;;  %v387_v32 = vld [vmem:[#allocation7 + $0x50] sm:$0xff]  ;;  %v506_v33 = vld [vmem:[#allocation8 + $0x40] sm:$0xff] }
  0xa3   : > { %v897_v31 = vpack.c.bf16 %v509_v29, %v507_v28  ;;  %v508_v34 = vld [vmem:[#allocation8 + $0x50] sm:$0xff]  ;;  %v867_v35 = vpack.c.bf16 %v387_v32, %v385_v30  ;;  %v390_v36 = vld [vmem:[#allocation7 + $0x68] sm:$0xff]  ;;  %v392_v37 = vld [vmem:[#allocation7 + $0x78] sm:$0xff] }
  0xa4   : > { %864 = vmatpush1.bf16.msra.mxu0 %v863_v22  ;;  %v511_v38 = vld [vmem:[#allocation8 + $0x68] sm:$0xff]  ;;  %v899_v39 = vpack.c.bf16 %v508_v34, %v506_v33  ;;  %v869_v40 = vpack.c.bf16 %v392_v37, %v390_v36  ;;  %v513_v41 = vld [vmem:[#allocation8 + $0x78] sm:$0xff]  ;;  %v389_v42 = vld [vmem:[#allocation7 + $0x60] sm:$0xff] }
  0xa5   : > { %896 = vmatpush1.bf16.msra.mxu1 %v895_v26  ;;  %866 = vmatprep.subr.bf16.mxu0 %v865_v27  ;;  %v391_v43 = vld [vmem:[#allocation7 + $0x70] sm:$0xff]  ;;  %v901_v44 = vpack.c.bf16 %v513_v41, %v511_v38  ;;  %v510_v45 = vld [vmem:[#allocation8 + $0x60] sm:$0xff]  ;;  %v394_v47 = vld [vmem:[#allocation7 + $0x88] sm:$0xff] }
  0xa6   : > { %898 = vmatprep.subr.bf16.mxu1 %v897_v31  ;;  %v512_v46 = vld [vmem:[#allocation8 + $0x70] sm:$0xff]  ;;  %v396_v48 = vld [vmem:[#allocation7 + $0x98] sm:$0xff]  ;;  %v515_v49 = vld [vmem:[#allocation8 + $0x88] sm:$0xff]  ;;  %v871_v51 = vpack.c.bf16 %v391_v43, %v389_v42 }
  0xa7   : > { %v517_v50 = vld [vmem:[#allocation8 + $0x98] sm:$0xff]  ;;  %v903_v52 = vpack.c.bf16 %v512_v46, %v510_v45  ;;  %v873_v53 = vpack.c.bf16 %v396_v48, %v394_v47  ;;  %v393_v54 = vld [vmem:[#allocation7 + $0x80] sm:$0xff]  ;;  %v395_v55 = vld [vmem:[#allocation7 + $0x90] sm:$0xff] }
  0xa8   : > { %868 = vmatpush1.bf16.msra.mxu0 %v867_v35  ;;  %v514_v56 = vld [vmem:[#allocation8 + $0x80] sm:$0xff]  ;;  %v905_v57 = vpack.c.bf16 %v517_v50, %v515_v49  ;;  %v516_v58 = vld [vmem:[#allocation8 + $0x90] sm:$0xff]  ;;  %v398_v59 = vld [vmem:[#allocation7 + $0xa8] sm:$0xff]  ;;  %v875_v63 = vpack.c.bf16 %v395_v55, %v393_v54 }
  0xa9   : > { %900 = vmatpush1.bf16.msra.mxu1 %v899_v39  ;;  %870 = vmatprep.subr.bf16.mxu0 %v869_v40  ;;  %v400_v60 = vld [vmem:[#allocation7 + $0xb8] sm:$0xff]  ;;  %v519_v61 = vld [vmem:[#allocation8 + $0xa8] sm:$0xff]  ;;  %v907_v1 = vpack.c.bf16 %v516_v58, %v514_v56  ;;  %v397_v3 = vld [vmem:[#allocation7 + $0xa0] sm:$0xff] }
  0xaa   : > { %902 = vmatprep.subr.bf16.mxu1 %v901_v44  ;;  %v521_v62 = vld [vmem:[#allocation8 + $0xb8] sm:$0xff]  ;;  %v877_v2 = vpack.c.bf16 %v400_v60, %v398_v59  ;;  %v399_v4 = vld [vmem:[#allocation7 + $0xb0] sm:$0xff]  ;;  %v518_v5 = vld [vmem:[#allocation8 + $0xa0] sm:$0xff] }
  0xab   : > { %v909_v6 = vpack.c.bf16 %v521_v62, %v519_v61  ;;  %v520_v7 = vld [vmem:[#allocation8 + $0xb0] sm:$0xff]  ;;  %v402_v8 = vld [vmem:[#allocation7 + $0xc8] sm:$0xff]  ;;  %v404_v9 = vld [vmem:[#allocation7 + $0xd8] sm:$0xff]  ;;  %v879_v12 = vpack.c.bf16 %v399_v4, %v397_v3 }
  0xac   : > { %872 = vmatpush1.bf16.msra.mxu0 %v871_v51  ;;  %v523_v10 = vld [vmem:[#allocation8 + $0xc8] sm:$0xff]  ;;  %v525_v11 = vld [vmem:[#allocation8 + $0xd8] sm:$0xff]  ;;  %v911_v13 = vpack.c.bf16 %v520_v7, %v518_v5  ;;  %v881_v14 = vpack.c.bf16 %v404_v9, %v402_v8  ;;  %v401_v15 = vld [vmem:[#allocation7 + $0xc0] sm:$0xff] }
  0xad   : > { %904 = vmatpush1.bf16.msra.mxu1 %v903_v52  ;;  %874 = vmatprep.subr.bf16.mxu0 %v873_v53  ;;  %v403_v16 = vld [vmem:[#allocation7 + $0xd0] sm:$0xff]  ;;  %v522_v17 = vld [vmem:[#allocation8 + $0xc0] sm:$0xff]  ;;  %v913_v18 = vpack.c.bf16 %v525_v11, %v523_v10  ;;  %v406_v20 = vld [vmem:[#allocation7 + $0xe8] sm:$0xff] }
  0xae   : > { %906 = vmatprep.subr.bf16.mxu1 %v905_v57  ;;  %v524_v19 = vld [vmem:[#allocation8 + $0xd0] sm:$0xff]  ;;  %v408_v21 = vld [vmem:[#allocation7 + $0xf8] sm:$0xff]  ;;  %v527_v22 = vld [vmem:[#allocation8 + $0xe8] sm:$0xff]  ;;  %v883_v24 = vpack.c.bf16 %v403_v16, %v401_v15 }
  0xaf   : > { %v529_v23 = vld [vmem:[#allocation8 + $0xf8] sm:$0xff]  ;;  %v915_v25 = vpack.c.bf16 %v524_v19, %v522_v17  ;;  %v885_v26 = vpack.c.bf16 %v408_v21, %v406_v20  ;;  %v405_v27 = vld [vmem:[#allocation7 + $0xe0] sm:$0xff]  ;;  %v407_v28 = vld [vmem:[#allocation7 + $0xf0] sm:$0xff] }
  0xb0   : > { %876 = vmatpush1.bf16.msra.mxu0 %v875_v63  ;;  %v917_v29 = vpack.c.bf16 %v529_v23, %v527_v22  ;;  %v526_v30 = vld [vmem:[#allocation8 + $0xe0] sm:$0xff]  ;;  %v528_v31 = vld [vmem:[#allocation8 + $0xf0] sm:$0xff]  ;;  %v887_v32 = vpack.c.bf16 %v407_v28, %v405_v27  ;;  %v370_v36 = vld [vmem:[%s1491_s11 + $0x8] sm:$0xff] }
  0xb1   : > { %908 = vmatpush1.bf16.msra.mxu1 %v907_v1  ;;  %878 = vmatprep.subr.bf16.mxu0 %v877_v2  ;;  %v919_v33 = vpack.c.bf16 %v528_v31, %v526_v30  ;;  %v369_v34 = vld [vmem:[%s1491_s11] sm:$0xff]  ;;  %v374_v37 = vld [vmem:[%s1499_s9 + $0x8] sm:$0xff]  ;;  %v371_v38 = vld [vmem:[%s1491_s11 + $0x10] sm:$0xff] }
  0xb2   : > { %910 = vmatprep.subr.bf16.mxu1 %v909_v6  ;;  %v373_v35 = vld [vmem:[%s1499_s9] sm:$0xff]  ;;  %v375_v39 = vld [vmem:[%s1499_s9 + $0x10] sm:$0xff]  ;;  %v372_v40 = vld [vmem:[%s1491_s11 + $0x18] sm:$0xff]  ;;  %s1132_s11 = scalar_lea.vmem %s1545_s19, 512 }
  0xb3   : > { %v376_v41 = vld [vmem:[%s1499_s9 + $0x18] sm:$0xff]  ;;  %v842_v42 = vld [vmem:[%s1593_s4] ss:$0 sm:$0xff]  ;;  %p1133_p2 = scmp.ne.s32.totalorder %s1545_s19, %s1132_s11  ;;  %p1140_p5 = scmp.lt.s32.totalorder %s1138_s3, %s1132_s11 }
  0xb4   : > { %880 = vmatpush1.bf16.msra.mxu0 %v879_v12  ;;  %v843_v43 = vld [vmem:[%s1594_s5] ss:$0 sm:$0xff] }
  0xb5   : > { %912 = vmatpush1.bf16.msra.mxu1 %v911_v13  ;;  %882 = vmatprep.subr.bf16.mxu0 %v881_v14  ;;  %p1134_p6 = pnand %p1133_p2, %p1621_p13  ;;  %p1141_p3 = por %p1140_p5, %p1139_p4 }
  0xb6   : > { %914 = vmatprep.subr.bf16.mxu1 %v913_v18 }
  0xb7   : > { %p1135_p10 = pneg %p1134_p6 }
  0xb8   : > { %884 = vmatpush1.bf16.msra.mxu0 %v883_v24 }
  0xb9   : > { %916 = vmatpush1.bf16.msra.mxu1 %v915_v25  ;;  %886 = vmatprep.subr.bf16.mxu0 %v885_v26  ;;  %p1142_p7 = pnand %p1141_p3, %p1135_p10 }
  0xba   : > { %918 = vmatprep.subr.bf16.mxu1 %v917_v29 }
  0xbc   : > { %888 = vmatpush1.bf16.msra.mxu0 %v887_v32 }
  0xbd   : > { %920 = vmatpush1.bf16.msra.mxu1 %v919_v33 }
  0xbf   : > { %474 = vmatmul.mubr.f32.vlgmr.msra.gmra.mrb[0].mxu0 %v369_v34 }
  0xc0   : > { %595 = vmatmul.mubr.f32.vlgmr.msra.gmra.mrb[0].mxu1 %v373_v35  ;;  %479 = vmatprep.mubr.f32.mxu0 %v1220_v0 }
  0xc1   : > { %600 = vmatprep.mubr.f32.mxu1 %v1220_v0 }
  0xc3   : > { %480 = vmatmul.mubr.f32.gmra.mrb[2].mxu0 %v370_v36 }
  0xc4   : > { %601 = vmatmul.mubr.f32.gmra.mrb[2].mxu1 %v374_v37  ;;  %485 = vmatprep.mubr.f32.mxu0 %v1220_v0 }
  0xc5   : > { %606 = vmatprep.mubr.f32.mxu1 %v1220_v0 }
  0xc7   : > { %486 = vmatmul.mubr.f32.gmra.mrb[4].mxu0 %v371_v38 }
  0xc8   : > { %607 = vmatmul.mubr.f32.gmra.mrb[4].mxu1 %v375_v39  ;;  %491 = vmatprep.mubr.f32.mxu0 %v1220_v0 }
  0xc9   : > { %612 = vmatprep.mubr.f32.mxu1 %v1220_v0  ;;  %v844_v0 = vld [vmem:[%s1595_s6] ss:$0 sm:$0xff] }
  0xcb   : > { %492 = vmatmul.mubr.f32.gmra.mrb[6].mxu0 %v372_v40 }
  0xcc   : > { %613 = vmatmul.mubr.f32.gmra.mrb[6].mxu1 %v376_v41 }
 0x192   : > { %v475_v44 = vpop.f32.mrb[0].mxu0 }
 0x193   : > { %v626_v45 = vadd.f32 %v842_v42, %v475_v44  ;;  %v596_v46 = vpop.f32.mrb[0].mxu1  ;;  %v477_v47 = vpop.f32.mrb[1].mxu0 }
 0x194   : > { %v637_v48 = vadd.f32 %v843_v43, %v596_v46  ;;  %v598_v49 = vpop.f32.mrb[1].mxu1 }
 0x195   : > { %v641_v50 = vadd.f32 %v598_v49, %v477_v47 }
 0x196   : > { %v680_v51 = vsub.f32 %v626_v45, %v637_v48  ;;  %v481_v52 = vpop.f32.mrb[2].mxu0 }
 0x197   : > { %v652_v53 = vadd.f32 %v844_v0, %v641_v50  ;;  %v627_v54 = vadd.f32 %v842_v42, %v481_v52  ;;  %v602_v55 = vpop.f32.mrb[2].mxu1  ;;  %v483_v56 = vpop.f32.mrb[3].mxu0 }
 0x198   : > { %v638_v57 = vadd.f32 %v843_v43, %v602_v55  ;;  %v604_v58 = vpop.f32.mrb[3].mxu1 }
 0x199   : > { %v845_v59 = vmul.f32 -1.442695, %v652_v53  ;;  %v642_v60 = vadd.f32 %v604_v58, %v483_v56 }
 0x19a   : > { %v681_v61 = vsub.f32 %v627_v54, %v638_v57  ;;  %v487_v62 = vpop.f32.mrb[4].mxu0 }
 0x19b   : > { %1000 = vpow2.f32 %v845_v59  ;;  %v653_v63 = vadd.f32 %v844_v0, %v642_v60  ;;  %v628_v1 = vadd.f32 %v842_v42, %v487_v62  ;;  %v608_v2 = vpop.f32.mrb[4].mxu1  ;;  %v489_v3 = vpop.f32.mrb[5].mxu0 }
 0x19c   : > { %v639_v4 = vadd.f32 %v843_v43, %v608_v2  ;;  %v610_v5 = vpop.f32.mrb[5].mxu1 }
 0x19d   : > { %v846_v6 = vmul.f32 -1.442695, %v653_v63  ;;  %v643_v7 = vadd.f32 %v610_v5, %v489_v3 }
 0x19e   : > { %v682_v8 = vsub.f32 %v628_v1, %v639_v4  ;;  %v493_v9 = vpop.f32.mrb[6].mxu0 }
 0x19f   : > { %1002 = vpow2.f32 %v846_v6  ;;  %v654_v10 = vadd.f32 %v844_v0, %v643_v7  ;;  %v629_v11 = vadd.f32 %v842_v42, %v493_v9  ;;  %v614_v12 = vpop.f32.mrb[6].mxu1  ;;  %v495_v13 = vpop.f32.mrb[7].mxu0 }
 0x1a0   : > { %v640_v14 = vadd.f32 %v843_v43, %v614_v12  ;;  %v616_v15 = vpop.f32.mrb[7].mxu1 }
 0x1a1   : > { %v847_v16 = vmul.f32 -1.442695, %v654_v10  ;;  %v644_v17 = vadd.f32 %v616_v15, %v495_v13 }
 0x1a2   : > { %v683_v18 = vsub.f32 %v629_v11, %v640_v14 }
 0x1a3   : > { %1004 = vpow2.f32 %v847_v16  ;;  %v655_v19 = vadd.f32 %v844_v0, %v644_v17 }
 0x1a5   : > { %v1001_v20 = vpop.eup %1000  ;;  %v848_v21 = vmul.f32 -1.442695, %v655_v19 }
 0x1a6   : > { %v668_v22 = vadd.f32 1.0, %v1001_v20 }
 0x1a7   : > { %1006 = vpow2.f32 %v848_v21 }
 0x1a8   : > { %1008 = vrcp.f32 %v668_v22 }
 0x1a9   : > { %v1003_v23 = vpop.eup %1002 }
 0x1aa   : > { %v669_v24 = vadd.f32 1.0, %v1003_v23 }
 0x1ac   : > { %1010 = vrcp.f32 %v669_v24 }
 0x1ad   : > { %v1005_v25 = vpop.eup %1004 }
 0x1ae   : > { %v670_v26 = vadd.f32 1.0, %v1005_v25 }
 0x1b0   : > { %1012 = vrcp.f32 %v670_v26 }
 0x1b1   : > { %v1007_v27 = vpop.eup %1006 }
 0x1b2   : > { %v1009_v28 = vpop.eup %1008  ;;  %v671_v29 = vadd.f32 1.0, %v1007_v27 }
 0x1b3   : > { %v684_v30 = vmul.f32 %v1009_v28, %v680_v51 }
 0x1b4   : > { %1014 = vrcp.f32 %v671_v29 }
 0x1b5   : > { %v688_v31 = vadd.f32 %v684_v30, %v637_v48 }
 0x1b6   : > { %v1011_v32 = vpop.eup %1010 }
 0x1b7   : > { %692 = vst [vmem:[%s365_s18] sm:$0xff] %v688_v31  ;;  %v685_v33 = vmul.f32 %v1011_v32, %v681_v61 }
 0x1b9   : > { %v689_v34 = vadd.f32 %v685_v33, %v638_v57 }
 0x1ba   : > { %v1013_v35 = vpop.eup %1012 }
 0x1bb   : > { %693 = vst [vmem:[%s365_s18 + $0x8] sm:$0xff] %v689_v34  ;;  %v686_v36 = vmul.f32 %v1013_v35, %v682_v8 }
 0x1bd   : > { %v690_v37 = vadd.f32 %v686_v36, %v639_v4 }
 0x1be   : > { %v1015_v38 = vpop.eup %1014 }
 0x1bf   : > { %694 = vst [vmem:[%s365_s18 + $0x10] sm:$0xff] %v690_v37  ;;  %v687_v39 = vmul.f32 %v1015_v38, %v683_v18 }
 0x1c1   : > { %v691_v40 = vadd.f32 %v687_v39, %v640_v14 }
 0x1c3   : > { %695 = vst [vmem:[%s365_s18 + $0x18] sm:$0xff] %v691_v40 }
 0x1c4   : > { %1145 = shalt.err (!%p1142_p7)
}
 0x1c5   : > { %s1146_s9 = scalar_lea.hbm %s1543_s22, 512  ;;  %s1150_s29 = scalar_lea.hbm %s1596_s7, 1024 }
 0x1c6   : > { %p1147_p9 = scmp.ne.s32.totalorder %s1543_s22, %s1146_s9  ;;  %p1151_p11 = scmp.lt.u32.totalorder %s1543_s22, %s1596_s7 }
 0x1c7   : > { %p1152_p1 = scmp.lt.u32.totalorder %s1150_s29, %s1146_s9  ;;  %p1154_p2 = scmp.lt.u32.totalorder %s1146_s9, %s1543_s22 }
 0x1c8   : > { %p1148_p0 = pnand %p1147_p9, %p1621_p13 }
 0x1c9   : > { %p1153_p12 = por %p1152_p1, %p1151_p11 }
 0x1ca   : > { %p1149_p8 = pneg %p1148_p0 }
 0x1cb   : > { %p1155_p6 = por %p1154_p2, %p1153_p12 }
 0x1cd   : > { %p1156_p10 = pnand %p1155_p6, %p1149_p8 }
 0x1cf   : > { %1159 = shalt.err (!%p1156_p10)
}
 0x1d0   : > { %s1222_s21 = smov 128   ;;  %s1223_s18 = smov 8  }
 0x1d1   : > { %933 = dma.vmem_to_hbm [thread:$0]  (%p1621_p13), %s1545_s19, 512, %s1543_s22, %s697_s20, %s1222_s21, %s1222_s21, %s1223_s18  }
 0x1d2 PF: > { %s725_s2 = sand.u32 1, %s1198_s24   ;;  %p1622_p4 = scmp.ne.s32.totalorder %s1605_s8, 0 }
 0x1d3   : > { %p1623_p5 = scmp.ge.s32.totalorder %s1210_s27, 2  ;;  %s726_s15 = scalar_lea.sflag [#allocation4], %s725_s2 }
 0x1d5   : > { %p950_p3 = pnand %p1623_p5, %p1622_p4 }
 0x1d7   : > { %1193 = dma.done.wait (!%p950_p3), %s726_s15, 512  }
 0x1d8   : > { %1195 = vsyncadd (!%p950_p3), %s726_s15, 4294966784  ;;  %s1624_s14 = sld [smem:[#allocation16_spill]]  ;;  %p24_p7 = scmp.ge.s32.totalorder %s1374_s13, 4  }
 0x1d9   : > { %s1625_s24 = smov %s1202_s25  ;;  %s1626_s25 = smov %s1206_s26 }
 0x1da   : > { %s1628_s27 = smov %s1374_s13  ;;  %26 = sbr.rel (!%p24_p7) target bundleno = 12 (0xc), region = 114 }
 0x1de   : > { %s1627_s26 = smov %s1624_s14 }
 0x1e1   :  { %731 = vsyncpa [#allocation3], 1 }
 0x1e2   :  { %733 = vsyncpa [#allocation3 + $0x1], 1 }
 0x1e3   :  { %734 = vsyncpa [#allocation6], 1 }
 0x1e4   :  { %736 = vsyncpa [#allocation6 + $0x1], 1 }
 0x1e5   :  { %737 = vsyncpa [#allocation9], 1 }
 0x1e6   :  { %738 = vsyncpa [#allocation4], 1 }
 0x1e7   :  { %740 = vsyncpa [#allocation4 + $0x1], 1 }

</bundles_post_ra>
